<compile_context>
chip_gen: v6e
topology: v6e:2x2x1
jax: 0.10.0
libtpu: 0.0.40
codegen_flags: <defaults>
</compile_context>

<pallas_src>
import functools

import jax
import jax.numpy as jnp
from jax.experimental import pallas as pl
from jax.experimental.pallas import tpu as pltpu


# ---------------------------------------------------------------------------
# Conv 3x3 (+BN, +optional ReLU, +optional SE max-pool, +optional projection
# shortcut) -- one image per grid step, single K=9*Cin GEMM in VMEM.
# ---------------------------------------------------------------------------
def _im2col_patches(x_ref, stride, hq, ho, wo):
    """Gather the 9 conv taps from the phase-split padded image (already in
    VMEM) and concatenate them into an (Ho*Wo, 9*Cin) bf16 patch matrix."""
    taps = []
    for kh in range(3):
        for kw in range(3):
            r0 = ((kh % stride) * stride + (kw % stride)) * hq + kh // stride
            c0 = kw // stride
            t = x_ref[0, r0:r0 + ho, c0:c0 + wo, :]          # (Ho, Wo, Cin) bf16
            taps.append(t.reshape(ho * wo, t.shape[-1]))
    return jnp.concatenate(taps, axis=-1)                    # (Ho*Wo, 9*Cin) bf16


def _conv_bn(x_ref, w_ref, s_ref, b_ref, o_ref, stride, hq, ho, wo, relu):
    patches = _im2col_patches(x_ref, stride, hq, ho, wo)
    y = jnp.dot(patches, w_ref[...], preferred_element_type=jnp.float32)
    y = y * s_ref[...] + b_ref[...]                          # folded BN (f32)
    if relu:
        y = jnp.maximum(y, 0.0)
    yb = y.astype(o_ref.dtype)
    o_ref[0] = yb                                            # compact (Ho*Wo, Cout)
    return yb


def _conv_bn_kernel(x_ref, w_ref, s_ref, b_ref, o_ref, *,
                    stride, hq, ho, wo, relu):
    _conv_bn(x_ref, w_ref, s_ref, b_ref, o_ref, stride, hq, ho, wo, relu)


def _conv_bn_pool_kernel(x_ref, w_ref, s_ref, b_ref, o_ref, mx_ref, *,
                         stride, hq, ho, wo, relu):
    yb = _conv_bn(x_ref, w_ref, s_ref, b_ref, o_ref, stride, hq, ho, wo, relu)
    # fused SE global channel-max pool (on the value actually stored in out1)
    mx_ref[0] = jnp.max(yb.astype(jnp.float32), axis=0, keepdims=True)


def _conv_bn_proj_kernel(x_ref, w_ref, s_ref, b_ref, wsc_ref, ssc_ref, bsc_ref,
                         o_ref, osc_ref, *, stride, hq, ho, wo, relu):
    _conv_bn(x_ref, w_ref, s_ref, b_ref, o_ref, stride, hq, ho, wo, relu)
    # 1x1 shortcut conv (stride s, no padding) reads x[s*i, s*j] = xp[s*i+1, s*j+1],
    # i.e. phase plane (1%s, 1%s) at offset (1//s, 1//s) -- already in VMEM.
    r0 = ((1 % stride) * stride + (1 % stride)) * hq + 1 // stride
    c0 = 1 // stride
    xs = x_ref[0, r0:r0 + ho, c0:c0 + wo, :]
    xs = xs.reshape(ho * wo, xs.shape[-1])
    ysc = jnp.dot(xs, wsc_ref[...], preferred_element_type=jnp.float32)
    osc_ref[0] = (ysc * ssc_ref[...] + bsc_ref[...]).astype(osc_ref.dtype)


def conv3x3_bn(xpp, w_mat, scale, bias, *, stride, ho, wo, relu,
               pool=False, proj_args=None):
    """xpp: (N, s*s*Hq, Wq, Cin) phase-split padded image (bf16).
    Returns a tuple: (out,[, shortcut][, pooled_max])."""
    assert not (pool and proj_args is not None)
    n, rows, wq, cin = xpp.shape
    cout = w_mat.shape[-1]
    hq = rows // (stride * stride)
    kw = dict(stride=stride, hq=hq, ho=ho, wo=wo, relu=relu)

    in_specs = [
        pl.BlockSpec((1, rows, wq, cin), lambda b: (b, 0, 0, 0)),
        pl.BlockSpec((9 * cin, cout), lambda b: (0, 0)),
        pl.BlockSpec((1, cout), lambda b: (0, 0)),
        pl.BlockSpec((1, cout), lambda b: (0, 0)),
    ]
    inputs = [xpp, w_mat, scale, bias]
    out_shape = [jax.ShapeDtypeStruct((n, ho * wo, cout), jnp.bfloat16)]
    out_specs = [pl.BlockSpec((1, ho * wo, cout), lambda b: (b, 0, 0))]

    if proj_args is not None:
        wsc, ssc, bsc = proj_args
        kernel = functools.partial(_conv_bn_proj_kernel, **kw)
        in_specs += [
            pl.BlockSpec((cin, cout), lambda b: (0, 0)),
            pl.BlockSpec((1, cout), lambda b: (0, 0)),
            pl.BlockSpec((1, cout), lambda b: (0, 0)),
        ]
        inputs += [wsc, ssc, bsc]
        out_shape.append(jax.ShapeDtypeStruct((n, ho * wo, cout), jnp.bfloat16))
        out_specs.append(pl.BlockSpec((1, ho * wo, cout), lambda b: (b, 0, 0)))
    elif pool:
        kernel = functools.partial(_conv_bn_pool_kernel, **kw)
        out_shape.append(jax.ShapeDtypeStruct((n, 1, cout), jnp.float32))
        out_specs.append(pl.BlockSpec((1, 1, cout), lambda b: (b, 0, 0)))
    else:
        kernel = functools.partial(_conv_bn_kernel, **kw)

    return pl.pallas_call(
        kernel,
        out_shape=tuple(out_shape),
        grid=(n,),
        in_specs=in_specs,
        out_specs=tuple(out_specs),
        compiler_params=pltpu.CompilerParams(
            dimension_semantics=("parallel",),
            vmem_limit_bytes=32 * 1024 * 1024),
    )(*inputs)


# ---------------------------------------------------------------------------
# Lane-dense SE-scale * out1 + shortcut + final ReLU epilogue
# ---------------------------------------------------------------------------
def _fuse_kernel(o1_ref, sh_ref, s_ref, o_ref):
    y = o1_ref[0].astype(jnp.float32) * s_ref[0] + sh_ref[0].astype(jnp.float32)
    o_ref[0] = jnp.maximum(y, 0.0).astype(o_ref.dtype)


def fuse_se_residual(out1, short, se_scale, tile_rows=512):
    """out1, short: (N, HW, C) bf16;  se_scale: (N, C) f32 -> (N, HW, C) bf16."""
    n, hw, c = out1.shape
    assert short.shape == out1.shape
    lane_dense = (128 % c == 0) and ((hw * c) % 128 == 0)
    if lane_dense:
        lanes = 128
        r = hw * c // 128
        o1 = out1.reshape(n, r, lanes)
        sh = short.reshape(n, r, lanes)
        sc = jnp.tile(se_scale.reshape(n, 1, c), (1, 1, lanes // c))
    else:
        lanes, r = c, hw
        o1, sh = out1, short
        sc = se_scale.reshape(n, 1, c)
    tr = r if r <= tile_rows else tile_rows

    out = pl.pallas_call(
        _fuse_kernel,
        out_shape=jax.ShapeDtypeStruct((n, r, lanes), jnp.bfloat16),
        grid=(n, pl.cdiv(r, tr)),
        in_specs=[
            pl.BlockSpec((1, tr, lanes), lambda b, m: (b, m, 0)),
            pl.BlockSpec((1, tr, lanes), lambda b, m: (b, m, 0)),
            pl.BlockSpec((1, 1, lanes), lambda b, m: (b, 0, 0)),
        ],
        out_specs=pl.BlockSpec((1, tr, lanes), lambda b, m: (b, m, 0)),
        input_output_aliases={1: 0},          # write result over the shortcut buffer
        compiler_params=pltpu.CompilerParams(
            dimension_semantics=("parallel", "parallel")),
    )(o1, sh, sc)
    return out.reshape(n, hw, c)


# ---------------------------------------------------------------------------
# Plain-JAX glue: padding / phase split, BN folding, weight repacking
# ---------------------------------------------------------------------------
def pad_and_phase(x, stride):
    """(N, H, W, C) -> (N, s*s*Hq, Wq, C): zero-pad (top/left 1) and split into
    s*s phase planes so every conv tap becomes a contiguous 2-D window.
    Data volume stays ~= the padded input (no 9x im2col blow-up)."""
    n, h, w, c = x.shape
    s = stride
    ho = (h - 1) // s + 1
    wo = (w - 1) // s + 1
    hp = -(-max(s * (ho - 1) + 3, h + 2) // s) * s
    wp = -(-max(s * (wo - 1) + 3, w + 2) // s) * s
    xp = jnp.pad(x, ((0, 0), (1, hp - h - 1), (1, wp - w - 1), (0, 0)))
    hq, wq = hp // s, wp // s
    xpp = xp.reshape(n, hq, s, wq, s, c).transpose(0, 2, 4, 1, 3, 5)
    xpp = xpp.reshape(n, s * s * hq, wq, c)
    return xpp, ho, wo


def bn_fold(gamma, beta, mean, var, eps=1e-5):
    scale = gamma / jnp.sqrt(var + eps)
    bias = beta - mean * scale
    return (scale.reshape(1, -1).astype(jnp.float32),
            bias.reshape(1, -1).astype(jnp.float32))


def conv_w_to_mat(w_oihw):
    """(Cout, Cin, 3, 3) -> (9*Cin, Cout) bf16, rows ordered (kh, kw, cin)."""
    cout = w_oihw.shape[0]
    return jnp.transpose(w_oihw, (2, 3, 1, 0)).reshape(-1, cout).astype(jnp.bfloat16)


def init_params(key, cin, cout, stride):
    ks = jax.random.split(key, 24)
    f32 = jnp.float32
    p = {
        "w_conv1": 0.1 * jax.random.normal(ks[0], (cout, cin, 3, 3), f32),
        "bn1_gamma": 1.0 + 0.1 * jax.random.normal(ks[1], (cout,), f32),
        "bn1_beta": 0.05 * jax.random.normal(ks[2], (cout,), f32),
        "bn1_mean": 0.02 * jax.random.normal(ks[3], (cout,), f32),
        "bn1_var": jnp.abs(1.0 + 0.1 * jax.random.normal(ks[4], (cout,), f32)),
        "w_conv2": 0.1 * jax.random.normal(ks[5], (cout, cout, 3, 3), f32),
        "bn2_gamma": 1.0 + 0.1 * jax.random.normal(ks[6], (cout,), f32),
        "bn2_beta": 0.05 * jax.random.normal(ks[7], (cout,), f32),
        "bn2_mean": 0.02 * jax.random.normal(ks[8], (cout,), f32),
        "bn2_var": jnp.abs(1.0 + 0.1 * jax.random.normal(ks[9], (cout,), f32)),
        "fc2_w": 0.1 * jax.random.normal(ks[10], (cout, cout // 16), f32),
        "fc2_b": 0.05 * jax.random.normal(ks[11], (1, cout // 16), f32),
        "fc4_w": 0.1 * jax.random.normal(ks[12], (cout // 16, cout), f32),
        "fc4_b": 0.05 * jax.random.normal(ks[13], (1, cout), f32),
    }
    if stride != 1 or cin != cout:
        p.update({
            "w_sc": 0.1 * jax.random.normal(ks[14], (cout, cin, 1, 1), f32),
            "bnsc_gamma": 1.0 + 0.1 * jax.random.normal(ks[15], (cout,), f32),
            "bnsc_beta": 0.05 * jax.random.normal(ks[16], (cout,), f32),
            "bnsc_mean": 0.02 * jax.random.normal(ks[17], (cout,), f32),
            "bnsc_var": jnp.abs(1.0 + 0.1 * jax.random.normal(ks[18], (cout,), f32)),
        })
    return p


# ---------------------------------------------------------------------------
# ResidualBlock forward (input/output in PyTorch NCHW)
# ---------------------------------------------------------------------------
@functools.partial(jax.jit, static_argnums=2)
def residual_block_forward(x_nchw, params, stride):
    x = jnp.transpose(x_nchw, (0, 2, 3, 1)).astype(jnp.bfloat16)   # -> NHWC, bf16
    n, h, w, cin = x.shape
    cout = params["w_conv1"].shape[0]
    need_proj = (stride != 1) or (cin != cout)

    # left branch, conv1: 3x3 stride s + BN + ReLU   (+ fused projection shortcut)
    s1, b1 = bn_fold(params["bn1_gamma"], params["bn1_beta"],
                     params["bn1_mean"], params["bn1_var"])
    w1 = conv_w_to_mat(params["w_conv1"])
    xpp, ho, wo = pad_and_phase(x, stride)
    if need_proj:
        ssc, bsc = bn_fold(params["bnsc_gamma"], params["bnsc_beta"],
                           params["bnsc_mean"], params["bnsc_var"])
        wsc = params["w_sc"][:, :, 0, 0].T.astype(jnp.bfloat16)
        y1, short = conv3x3_bn(xpp, w1, s1, b1, stride=stride, ho=ho, wo=wo,
                               relu=True, proj_args=(wsc, ssc, bsc))
    else:
        (y1,) = conv3x3_bn(xpp, w1, s1, b1, stride=stride, ho=ho, wo=wo, relu=True)
        short = x.reshape(n, h * w, cin)                            # identity shortcut

    # left branch, conv2: 3x3 stride 1 + BN (no ReLU), SE global max pool fused
    s2, b2 = bn_fold(params["bn2_gamma"], params["bn2_beta"],
                     params["bn2_mean"], params["bn2_var"])
    w2 = conv_w_to_mat(params["w_conv2"])
    xpp2, _, _ = pad_and_phase(y1.reshape(n, ho, wo, cout), 1)
    out1, pooled = conv3x3_bn(xpp2, w2, s2, b2, stride=1, ho=ho, wo=wo,
                              relu=False, pool=True)

    # SE fc path (tiny micro-GEMMs) in plain XLA -- no sigmoid, per the reference
    p = pooled.reshape(n, cout)
    hmid = jnp.maximum(p @ params["fc2_w"] + params["fc2_b"], 0.0)
    se = hmid @ params["fc4_w"] + params["fc4_b"]                   # (n, cout) f32

    # SE channel scale * out1 + shortcut + final ReLU (single lane-dense kernel)
    out = fuse_se_residual(out1, short, se)                         # (n, ho*wo, cout) bf16

    out = out.astype(jnp.float32).reshape(n, ho, wo, cout)
    return jnp.transpose(out, (0, 3, 1, 2))                         # -> NCHW, f32


# ---------------------------------------------------------------------------
# Pure-JAX f32 reference (mirrors the PyTorch ResidualBlock in eval mode)
# ---------------------------------------------------------------------------
def _bn_ref(y, g, b, m, v, eps=1e-5):
    sc = (g / jnp.sqrt(v + eps))[None, :, None, None]
    return (y - m[None, :, None, None]) * sc + b[None, :, None, None]


def reference_forward(x_nchw, params, stride):
    xf = x_nchw.astype(jnp.float32)
    y = jax.lax.conv_general_dilated(xf, params["w_conv1"], (stride, stride),
                                     ((1, 1), (1, 1)))
    y = jax.nn.relu(_bn_ref(y, params["bn1_gamma"], params["bn1_beta"],
                            params["bn1_mean"], params["bn1_var"]))
    out1 = jax.lax.conv_general_dilated(y, params["w_conv2"], (1, 1), ((1, 1), (1, 1)))
    out1 = _bn_ref(out1, params["bn2_gamma"], params["bn2_beta"],
                   params["bn2_mean"], params["bn2_var"])
    pooled = jnp.max(out1, axis=(2, 3))
    hmid = jax.nn.relu(pooled @ params["fc2_w"] + params["fc2_b"])
    se = hmid @ params["fc4_w"] + params["fc4_b"]
    out = se[:, :, None, None] * out1
    if stride != 1 or xf.shape[1] != params["w_conv1"].shape[0]:
        sc = jax.lax.conv_general_dilated(xf, params["w_sc"], (stride, stride),
                                          ((0, 0), (0, 0)))
        sc = _bn_ref(sc, params["bnsc_gamma"], params["bnsc_beta"],
                     params["bnsc_mean"], params["bnsc_var"])
    else:
        sc = xf
    return jax.nn.relu(out + sc)


if __name__ == "__main__":
    key = jax.random.PRNGKey(0)
    k_x, k_p, k_x2, k_p2 = jax.random.split(key, 4)

    # projection-shortcut block (stride 2, channel expansion 16 -> 32)
    n, cin, cout, h, w, stride = 2, 16, 32, 16, 16, 2
    x = jax.random.normal(k_x, (n, cin, h, w), jnp.float32)        # NCHW, like PyTorch
    params = init_params(k_p, cin, cout, stride)
    out = jax.block_until_ready(residual_block_forward(x, params, stride))
    ref = reference_forward(x, params, stride)
    assert out.shape == (n, cout, h // stride, w // stride), out.shape
    assert bool(jnp.all(jnp.isfinite(out)))
    assert bool(jnp.allclose(out, ref, rtol=0.05, atol=0.05)), \
        float(jnp.max(jnp.abs(out - ref)))

    # identity-shortcut block (stride 1, cin == cout)
    n2, c2, h2, w2 = 2, 32, 8, 8
    x2 = jax.random.normal(k_x2, (n2, c2, h2, w2), jnp.float32)
    params2 = init_params(k_p2, c2, c2, 1)
    out2 = jax.block_until_ready(residual_block_forward(x2, params2, 1))
    ref2 = reference_forward(x2, params2, 1)
    assert out2.shape == (n2, c2, h2, w2), out2.shape
    assert bool(jnp.all(jnp.isfinite(out2)))
    assert bool(jnp.allclose(out2, ref2, rtol=0.05, atol=0.05)), \
        float(jnp.max(jnp.abs(out2 - ref2)))

    print("KERNEL_OK")
</pallas_src>

<mosaic_0001>
module attributes {stable_mosaic.version = 11 : i64} {
  func.func @_conv_bn_proj_kernel(%arg0: i32, %arg1: memref<1x36x9x16xbf16, #tpu.memory_space<vmem>>, %arg2: memref<144x32xbf16, #tpu.memory_space<vmem>>, %arg3: memref<1x32xf32, #tpu.memory_space<vmem>>, %arg4: memref<1x32xf32, #tpu.memory_space<vmem>>, %arg5: memref<16x32xbf16, #tpu.memory_space<vmem>>, %arg6: memref<1x32xf32, #tpu.memory_space<vmem>>, %arg7: memref<1x32xf32, #tpu.memory_space<vmem>>, %arg8: memref<1x64x32xbf16, #tpu.memory_space<vmem>>, %arg9: memref<1x64x32xbf16, #tpu.memory_space<vmem>>) attributes {dimension_semantics = [#tpu.dimension_semantics<parallel>], iteration_bounds = array<i64: 2>, scalar_prefetch = 0 : i64, scratch_operands = 0 : i64, tpu.core_type = #tpu.core_type<tc>, window_params = [{transform_indices = @transform_0, window_bounds = array<i64: 1, 36, 9, 16>}, {pipeline_mode = #tpu.pipeline_mode<synchronous>, transform_indices = @transform_1, window_bounds = array<i64: 144, 32>}, {pipeline_mode = #tpu.pipeline_mode<synchronous>, transform_indices = @transform_2, window_bounds = array<i64: 1, 32>}, {pipeline_mode = #tpu.pipeline_mode<synchronous>, transform_indices = @transform_3, window_bounds = array<i64: 1, 32>}, {pipeline_mode = #tpu.pipeline_mode<synchronous>, transform_indices = @transform_4, window_bounds = array<i64: 16, 32>}, {pipeline_mode = #tpu.pipeline_mode<synchronous>, transform_indices = @transform_5, window_bounds = array<i64: 1, 32>}, {pipeline_mode = #tpu.pipeline_mode<synchronous>, transform_indices = @transform_6, window_bounds = array<i64: 1, 32>}, {transform_indices = @transform_7, window_bounds = array<i64: 1, 64, 32>}, {transform_indices = @transform_8, window_bounds = array<i64: 1, 64, 32>}]} {
    %c0 = arith.constant 0 : index
    %c0_0 = arith.constant 0 : index
    %c0_1 = arith.constant 0 : index
    %c0_2 = arith.constant 0 : index
    %0 = vector.load %arg1[%c0, %c0_0, %c0_1, %c0_2] : memref<1x36x9x16xbf16, #tpu.memory_space<vmem>>, vector<1x8x8x16xbf16>
    %1 = vector.shape_cast %0 : vector<1x8x8x16xbf16> to vector<8x8x16xbf16>
    %2 = vector.shape_cast %1 : vector<8x8x16xbf16> to vector<64x16xbf16>
    %c0_3 = arith.constant 0 : index
    %c9 = arith.constant 9 : index
    %c0_4 = arith.constant 0 : index
    %c0_5 = arith.constant 0 : index
    %3 = vector.load %arg1[%c0_3, %c9, %c0_4, %c0_5] : memref<1x36x9x16xbf16, #tpu.memory_space<vmem>>, vector<1x8x8x16xbf16>
    %4 = vector.shape_cast %3 : vector<1x8x8x16xbf16> to vector<8x8x16xbf16>
    %5 = vector.shape_cast %4 : vector<8x8x16xbf16> to vector<64x16xbf16>
    %c0_6 = arith.constant 0 : index
    %c0_7 = arith.constant 0 : index
    %c1 = arith.constant 1 : index
    %c0_8 = arith.constant 0 : index
    %6 = vector.load %arg1[%c0_6, %c0_7, %c1, %c0_8] : memref<1x36x9x16xbf16, #tpu.memory_space<vmem>>, vector<1x8x8x16xbf16>
    %7 = vector.shape_cast %6 : vector<1x8x8x16xbf16> to vector<8x8x16xbf16>
    %8 = vector.shape_cast %7 : vector<8x8x16xbf16> to vector<64x16xbf16>
    %c0_9 = arith.constant 0 : index
    %c18 = arith.constant 18 : index
    %c0_10 = arith.constant 0 : index
    %c0_11 = arith.constant 0 : index
    %9 = vector.load %arg1[%c0_9, %c18, %c0_10, %c0_11] : memref<1x36x9x16xbf16, #tpu.memory_space<vmem>>, vector<1x8x8x16xbf16>
    %10 = vector.shape_cast %9 : vector<1x8x8x16xbf16> to vector<8x8x16xbf16>
    %11 = vector.shape_cast %10 : vector<8x8x16xbf16> to vector<64x16xbf16>
    %c0_12 = arith.constant 0 : index
    %c27 = arith.constant 27 : index
    %c0_13 = arith.constant 0 : index
    %c0_14 = arith.constant 0 : index
    %12 = vector.load %arg1[%c0_12, %c27, %c0_13, %c0_14] : memref<1x36x9x16xbf16, #tpu.memory_space<vmem>>, vector<1x8x8x16xbf16>
    %13 = vector.shape_cast %12 : vector<1x8x8x16xbf16> to vector<8x8x16xbf16>
    %14 = vector.shape_cast %13 : vector<8x8x16xbf16> to vector<64x16xbf16>
    %c0_15 = arith.constant 0 : index
    %c18_16 = arith.constant 18 : index
    %c1_17 = arith.constant 1 : index
    %c0_18 = arith.constant 0 : index
    %15 = vector.load %arg1[%c0_15, %c18_16, %c1_17, %c0_18] : memref<1x36x9x16xbf16, #tpu.memory_space<vmem>>, vector<1x8x8x16xbf16>
    %16 = vector.shape_cast %15 : vector<1x8x8x16xbf16> to vector<8x8x16xbf16>
    %17 = vector.shape_cast %16 : vector<8x8x16xbf16> to vector<64x16xbf16>
    %c0_19 = arith.constant 0 : index
    %c1_20 = arith.constant 1 : index
    %c0_21 = arith.constant 0 : index
    %c0_22 = arith.constant 0 : index
    %18 = vector.load %arg1[%c0_19, %c1_20, %c0_21, %c0_22] : memref<1x36x9x16xbf16, #tpu.memory_space<vmem>>, vector<1x8x8x16xbf16>
    %19 = vector.shape_cast %18 : vector<1x8x8x16xbf16> to vector<8x8x16xbf16>
    %20 = vector.shape_cast %19 : vector<8x8x16xbf16> to vector<64x16xbf16>
    %c0_23 = arith.constant 0 : index
    %c10 = arith.constant 10 : index
    %c0_24 = arith.constant 0 : index
    %c0_25 = arith.constant 0 : index
    %21 = vector.load %arg1[%c0_23, %c10, %c0_24, %c0_25] : memref<1x36x9x16xbf16, #tpu.memory_space<vmem>>, vector<1x8x8x16xbf16>
    %22 = vector.shape_cast %21 : vector<1x8x8x16xbf16> to vector<8x8x16xbf16>
    %23 = vector.shape_cast %22 : vector<8x8x16xbf16> to vector<64x16xbf16>
    %c0_26 = arith.constant 0 : index
    %c1_27 = arith.constant 1 : index
    %c1_28 = arith.constant 1 : index
    %c0_29 = arith.constant 0 : index
    %24 = vector.load %arg1[%c0_26, %c1_27, %c1_28, %c0_29] : memref<1x36x9x16xbf16, #tpu.memory_space<vmem>>, vector<1x8x8x16xbf16>
    %25 = vector.shape_cast %24 : vector<1x8x8x16xbf16> to vector<8x8x16xbf16>
    %26 = vector.shape_cast %25 : vector<8x8x16xbf16> to vector<64x16xbf16>
    %27 = tpu.concatenate %2, %5, %8, %11, %14, %17, %20, %23, %26 in 1 : vector<64x16xbf16>, vector<64x16xbf16>, vector<64x16xbf16>, vector<64x16xbf16>, vector<64x16xbf16>, vector<64x16xbf16>, vector<64x16xbf16>, vector<64x16xbf16>, vector<64x16xbf16> -> vector<64x144xbf16>
    %c0_30 = arith.constant 0 : index
    %c0_31 = arith.constant 0 : index
    %28 = vector.load %arg2[%c0_30, %c0_31] : memref<144x32xbf16, #tpu.memory_space<vmem>>, vector<144x32xbf16>
    %cst = arith.constant dense<0.000000e+00> : vector<64x32xf32>
    %29 = tpu.matmul %27, %28, %cst {dimension_numbers = #tpu.dot_dimension_numbers<[1], [0], [0], [1], [0, 0, 1, 1], [], []>} : vector<64x144xbf16>, vector<144x32xbf16>, vector<64x32xf32> -> vector<64x32xf32>
    %c0_32 = arith.constant 0 : index
    %c0_33 = arith.constant 0 : index
    %30 = vector.load %arg3[%c0_32, %c0_33] : memref<1x32xf32, #tpu.memory_space<vmem>>, vector<1x32xf32>
    %31 = vector.broadcast %30 : vector<1x32xf32> to vector<64x32xf32>
    %32 = arith.mulf %29, %31 : vector<64x32xf32>
    %c0_34 = arith.constant 0 : index
    %c0_35 = arith.constant 0 : index
    %33 = vector.load %arg4[%c0_34, %c0_35] : memref<1x32xf32, #tpu.memory_space<vmem>>, vector<1x32xf32>
    %34 = vector.broadcast %33 : vector<1x32xf32> to vector<64x32xf32>
    %35 = arith.addf %32, %34 : vector<64x32xf32>
    %cst_36 = arith.constant 0.000000e+00 : f32
    %36 = vector.broadcast %cst_36 : f32 to vector<64x32xf32>
    %37 = arith.maximumf %35, %36 : vector<64x32xf32>
    %38 = arith.truncf %37 : vector<64x32xf32> to vector<64x32xbf16>
    %c0_37 = arith.constant 0 : index
    %c0_38 = arith.constant 0 : index
    %c0_39 = arith.constant 0 : index
    %39 = vector.load %arg8[%c0_37, %c0_38, %c0_39] : memref<1x64x32xbf16, #tpu.memory_space<vmem>>, vector<1x64x32xbf16>
    %40 = vector.shape_cast %39 : vector<1x64x32xbf16> to vector<64x32xbf16>
    %41 = vector.shape_cast %38 : vector<64x32xbf16> to vector<1x64x32xbf16>
    tpu.vector_store %arg8[%c0_37, %c0_38, %c0_39], %41 {strides = array<i32>} : memref<1x64x32xbf16, #tpu.memory_space<vmem>>, vector<1x64x32xbf16>,
    %c0_40 = arith.constant 0 : index
    %c27_41 = arith.constant 27 : index
    %c0_42 = arith.constant 0 : index
    %c0_43 = arith.constant 0 : index
    %42 = vector.load %arg1[%c0_40, %c27_41, %c0_42, %c0_43] : memref<1x36x9x16xbf16, #tpu.memory_space<vmem>>, vector<1x8x8x16xbf16>
    %43 = vector.shape_cast %42 : vector<1x8x8x16xbf16> to vector<8x8x16xbf16>
    %44 = vector.shape_cast %43 : vector<8x8x16xbf16> to vector<64x16xbf16>
    %c0_44 = arith.constant 0 : index
    %c0_45 = arith.constant 0 : index
    %45 = vector.load %arg5[%c0_44, %c0_45] : memref<16x32xbf16, #tpu.memory_space<vmem>>, vector<16x32xbf16>
    %cst_46 = arith.constant dense<0.000000e+00> : vector<64x32xf32>
    %46 = tpu.matmul %44, %45, %cst_46 {dimension_numbers = #tpu.dot_dimension_numbers<[1], [0], [0], [1], [0, 0, 1, 1], [], []>} : vector<64x16xbf16>, vector<16x32xbf16>, vector<64x32xf32> -> vector<64x32xf32>
    %c0_47 = arith.constant 0 : index
    %c0_48 = arith.constant 0 : index
    %47 = vector.load %arg6[%c0_47, %c0_48] : memref<1x32xf32, #tpu.memory_space<vmem>>, vector<1x32xf32>
    %48 = vector.broadcast %47 : vector<1x32xf32> to vector<64x32xf32>
    %49 = arith.mulf %46, %48 : vector<64x32xf32>
    %c0_49 = arith.constant 0 : index
    %c0_50 = arith.constant 0 : index
    %50 = vector.load %arg7[%c0_49, %c0_50] : memref<1x32xf32, #tpu.memory_space<vmem>>, vector<1x32xf32>
    %51 = vector.broadcast %50 : vector<1x32xf32> to vector<64x32xf32>
    %52 = arith.addf %49, %51 : vector<64x32xf32>
    %53 = arith.truncf %52 : vector<64x32xf32> to vector<64x32xbf16>
    %c0_51 = arith.constant 0 : index
    %c0_52 = arith.constant 0 : index
    %c0_53 = arith.constant 0 : index
    %54 = vector.load %arg9[%c0_51, %c0_52, %c0_53] : memref<1x64x32xbf16, #tpu.memory_space<vmem>>, vector<1x64x32xbf16>
    %55 = vector.shape_cast %54 : vector<1x64x32xbf16> to vector<64x32xbf16>
    %56 = vector.shape_cast %53 : vector<64x32xbf16> to vector<1x64x32xbf16>
    tpu.vector_store %arg9[%c0_51, %c0_52, %c0_53], %56 {strides = array<i32>} : memref<1x64x32xbf16, #tpu.memory_space<vmem>>, vector<1x64x32xbf16>,
    return
  }
  func.func @transform_0(%arg0: i32) -> (i32, i32, i32, i32) {
    %c0_i32 = arith.constant 0 : i32
    %c0_i32_0 = arith.constant 0 : i32
    %c0_i32_1 = arith.constant 0 : i32
    %c0_i32_2 = arith.constant 0 : i32
    return %arg0, %c0_i32, %c0_i32_0, %c0_i32_1 : i32, i32, i32, i32
  }
  func.func @transform_1(%arg0: i32) -> (i32, i32) {
    %c0_i32 = arith.constant 0 : i32
    %c0_i32_0 = arith.constant 0 : i32
    %c0_i32_1 = arith.constant 0 : i32
    return %c0_i32, %c0_i32_0 : i32, i32
  }
  func.func @transform_2(%arg0: i32) -> (i32, i32) {
    %c0_i32 = arith.constant 0 : i32
    %c0_i32_0 = arith.constant 0 : i32
    %c0_i32_1 = arith.constant 0 : i32
    return %c0_i32, %c0_i32_0 : i32, i32
  }
  func.func @transform_3(%arg0: i32) -> (i32, i32) {
    %c0_i32 = arith.constant 0 : i32
    %c0_i32_0 = arith.constant 0 : i32
    %c0_i32_1 = arith.constant 0 : i32
    return %c0_i32, %c0_i32_0 : i32, i32
  }
  func.func @transform_4(%arg0: i32) -> (i32, i32) {
    %c0_i32 = arith.constant 0 : i32
    %c0_i32_0 = arith.constant 0 : i32
    %c0_i32_1 = arith.constant 0 : i32
    return %c0_i32, %c0_i32_0 : i32, i32
  }
  func.func @transform_5(%arg0: i32) -> (i32, i32) {
    %c0_i32 = arith.constant 0 : i32
    %c0_i32_0 = arith.constant 0 : i32
    %c0_i32_1 = arith.constant 0 : i32
    return %c0_i32, %c0_i32_0 : i32, i32
  }
  func.func @transform_6(%arg0: i32) -> (i32, i32) {
    %c0_i32 = arith.constant 0 : i32
    %c0_i32_0 = arith.constant 0 : i32
    %c0_i32_1 = arith.constant 0 : i32
    return %c0_i32, %c0_i32_0 : i32, i32
  }
  func.func @transform_7(%arg0: i32) -> (i32, i32, i32) {
    %c0_i32 = arith.constant 0 : i32
    %c0_i32_0 = arith.constant 0 : i32
    %c0_i32_1 = arith.constant 0 : i32
    return %arg0, %c0_i32, %c0_i32_0 : i32, i32, i32
  }
  func.func @transform_8(%arg0: i32) -> (i32, i32, i32) {
    %c0_i32 = arith.constant 0 : i32
    %c0_i32_0 = arith.constant 0 : i32
    %c0_i32_1 = arith.constant 0 : i32
    return %arg0, %c0_i32, %c0_i32_0 : i32, i32, i32
  }
}

module attributes {stable_mosaic.version = 11 : i64} {
  func.func @_conv_bn_pool_kernel(%arg0: i32, %arg1: memref<1x10x10x32xbf16, #tpu.memory_space<vmem>>, %arg2: memref<288x32xbf16, #tpu.memory_space<vmem>>, %arg3: memref<1x32xf32, #tpu.memory_space<vmem>>, %arg4: memref<1x32xf32, #tpu.memory_space<vmem>>, %arg5: memref<1x64x32xbf16, #tpu.memory_space<vmem>>, %arg6: memref<1x1x32xf32, #tpu.memory_space<vmem>>) attributes {dimension_semantics = [#tpu.dimension_semantics<parallel>], iteration_bounds = array<i64: 2>, scalar_prefetch = 0 : i64, scratch_operands = 0 : i64, tpu.core_type = #tpu.core_type<tc>, window_params = [{transform_indices = @transform_0, window_bounds = array<i64: 1, 10, 10, 32>}, {pipeline_mode = #tpu.pipeline_mode<synchronous>, transform_indices = @transform_1, window_bounds = array<i64: 288, 32>}, {pipeline_mode = #tpu.pipeline_mode<synchronous>, transform_indices = @transform_2, window_bounds = array<i64: 1, 32>}, {pipeline_mode = #tpu.pipeline_mode<synchronous>, transform_indices = @transform_3, window_bounds = array<i64: 1, 32>}, {transform_indices = @transform_4, window_bounds = array<i64: 1, 64, 32>}, {transform_indices = @transform_5, window_bounds = array<i64: 1, 1, 32>}]} {
    %c0 = arith.constant 0 : index
    %c0_0 = arith.constant 0 : index
    %c0_1 = arith.constant 0 : index
    %c0_2 = arith.constant 0 : index
    %0 = vector.load %arg1[%c0, %c0_0, %c0_1, %c0_2] : memref<1x10x10x32xbf16, #tpu.memory_space<vmem>>, vector<1x8x8x32xbf16>
    %1 = vector.shape_cast %0 : vector<1x8x8x32xbf16> to vector<8x8x32xbf16>
    %2 = vector.shape_cast %1 : vector<8x8x32xbf16> to vector<64x32xbf16>
    %c0_3 = arith.constant 0 : index
    %c0_4 = arith.constant 0 : index
    %c1 = arith.constant 1 : index
    %c0_5 = arith.constant 0 : index
    %3 = vector.load %arg1[%c0_3, %c0_4, %c1, %c0_5] : memref<1x10x10x32xbf16, #tpu.memory_space<vmem>>, vector<1x8x8x32xbf16>
    %4 = vector.shape_cast %3 : vector<1x8x8x32xbf16> to vector<8x8x32xbf16>
    %5 = vector.shape_cast %4 : vector<8x8x32xbf16> to vector<64x32xbf16>
    %c0_6 = arith.constant 0 : index
    %c0_7 = arith.constant 0 : index
    %c2 = arith.constant 2 : index
    %c0_8 = arith.constant 0 : index
    %6 = vector.load %arg1[%c0_6, %c0_7, %c2, %c0_8] : memref<1x10x10x32xbf16, #tpu.memory_space<vmem>>, vector<1x8x8x32xbf16>
    %7 = vector.shape_cast %6 : vector<1x8x8x32xbf16> to vector<8x8x32xbf16>
    %8 = vector.shape_cast %7 : vector<8x8x32xbf16> to vector<64x32xbf16>
    %c0_9 = arith.constant 0 : index
    %c1_10 = arith.constant 1 : index
    %c0_11 = arith.constant 0 : index
    %c0_12 = arith.constant 0 : index
    %9 = vector.load %arg1[%c0_9, %c1_10, %c0_11, %c0_12] : memref<1x10x10x32xbf16, #tpu.memory_space<vmem>>, vector<1x8x8x32xbf16>
    %10 = vector.shape_cast %9 : vector<1x8x8x32xbf16> to vector<8x8x32xbf16>
    %11 = vector.shape_cast %10 : vector<8x8x32xbf16> to vector<64x32xbf16>
    %c0_13 = arith.constant 0 : index
    %c1_14 = arith.constant 1 : index
    %c1_15 = arith.constant 1 : index
    %c0_16 = arith.constant 0 : index
    %12 = vector.load %arg1[%c0_13, %c1_14, %c1_15, %c0_16] : memref<1x10x10x32xbf16, #tpu.memory_space<vmem>>, vector<1x8x8x32xbf16>
    %13 = vector.shape_cast %12 : vector<1x8x8x32xbf16> to vector<8x8x32xbf16>
    %14 = vector.shape_cast %13 : vector<8x8x32xbf16> to vector<64x32xbf16>
    %c0_17 = arith.constant 0 : index
    %c1_18 = arith.constant 1 : index
    %c2_19 = arith.constant 2 : index
    %c0_20 = arith.constant 0 : index
    %15 = vector.load %arg1[%c0_17, %c1_18, %c2_19, %c0_20] : memref<1x10x10x32xbf16, #tpu.memory_space<vmem>>, vector<1x8x8x32xbf16>
    %16 = vector.shape_cast %15 : vector<1x8x8x32xbf16> to vector<8x8x32xbf16>
    %17 = vector.shape_cast %16 : vector<8x8x32xbf16> to vector<64x32xbf16>
    %c0_21 = arith.constant 0 : index
    %c2_22 = arith.constant 2 : index
    %c0_23 = arith.constant 0 : index
    %c0_24 = arith.constant 0 : index
    %18 = vector.load %arg1[%c0_21, %c2_22, %c0_23, %c0_24] : memref<1x10x10x32xbf16, #tpu.memory_space<vmem>>, vector<1x8x8x32xbf16>
    %19 = vector.shape_cast %18 : vector<1x8x8x32xbf16> to vector<8x8x32xbf16>
    %20 = vector.shape_cast %19 : vector<8x8x32xbf16> to vector<64x32xbf16>
    %c0_25 = arith.constant 0 : index
    %c2_26 = arith.constant 2 : index
    %c1_27 = arith.constant 1 : index
    %c0_28 = arith.constant 0 : index
    %21 = vector.load %arg1[%c0_25, %c2_26, %c1_27, %c0_28] : memref<1x10x10x32xbf16, #tpu.memory_space<vmem>>, vector<1x8x8x32xbf16>
    %22 = vector.shape_cast %21 : vector<1x8x8x32xbf16> to vector<8x8x32xbf16>
    %23 = vector.shape_cast %22 : vector<8x8x32xbf16> to vector<64x32xbf16>
    %c0_29 = arith.constant 0 : index
    %c2_30 = arith.constant 2 : index
    %c2_31 = arith.constant 2 : index
    %c0_32 = arith.constant 0 : index
    %24 = vector.load %arg1[%c0_29, %c2_30, %c2_31, %c0_32] : memref<1x10x10x32xbf16, #tpu.memory_space<vmem>>, vector<1x8x8x32xbf16>
    %25 = vector.shape_cast %24 : vector<1x8x8x32xbf16> to vector<8x8x32xbf16>
    %26 = vector.shape_cast %25 : vector<8x8x32xbf16> to vector<64x32xbf16>
    %27 = tpu.concatenate %2, %5, %8, %11, %14, %17, %20, %23, %26 in 1 : vector<64x32xbf16>, vector<64x32xbf16>, vector<64x32xbf16>, vector<64x32xbf16>, vector<64x32xbf16>, vector<64x32xbf16>, vector<64x32xbf16>, vector<64x32xbf16>, vector<64x32xbf16> -> vector<64x288xbf16>
    %c0_33 = arith.constant 0 : index
    %c0_34 = arith.constant 0 : index
    %28 = vector.load %arg2[%c0_33, %c0_34] : memref<288x32xbf16, #tpu.memory_space<vmem>>, vector<288x32xbf16>
    %cst = arith.constant dense<0.000000e+00> : vector<64x32xf32>
    %29 = tpu.matmul %27, %28, %cst {dimension_numbers = #tpu.dot_dimension_numbers<[1], [0], [0], [1], [0, 0, 1, 1], [], []>} : vector<64x288xbf16>, vector<288x32xbf16>, vector<64x32xf32> -> vector<64x32xf32>
    %c0_35 = arith.constant 0 : index
    %c0_36 = arith.constant 0 : index
    %30 = vector.load %arg3[%c0_35, %c0_36] : memref<1x32xf32, #tpu.memory_space<vmem>>, vector<1x32xf32>
    %31 = vector.broadcast %30 : vector<1x32xf32> to vector<64x32xf32>
    %32 = arith.mulf %29, %31 : vector<64x32xf32>
    %c0_37 = arith.constant 0 : index
    %c0_38 = arith.constant 0 : index
    %33 = vector.load %arg4[%c0_37, %c0_38] : memref<1x32xf32, #tpu.memory_space<vmem>>, vector<1x32xf32>
    %34 = vector.broadcast %33 : vector<1x32xf32> to vector<64x32xf32>
    %35 = arith.addf %32, %34 : vector<64x32xf32>
    %36 = arith.truncf %35 : vector<64x32xf32> to vector<64x32xbf16>
    %c0_39 = arith.constant 0 : index
    %c0_40 = arith.constant 0 : index
    %c0_41 = arith.constant 0 : index
    %37 = vector.load %arg5[%c0_39, %c0_40, %c0_41] : memref<1x64x32xbf16, #tpu.memory_space<vmem>>, vector<1x64x32xbf16>
    %38 = vector.shape_cast %37 : vector<1x64x32xbf16> to vector<64x32xbf16>
    %39 = vector.shape_cast %36 : vector<64x32xbf16> to vector<1x64x32xbf16>
    tpu.vector_store %arg5[%c0_39, %c0_40, %c0_41], %39 {strides = array<i32>} : memref<1x64x32xbf16, #tpu.memory_space<vmem>>, vector<1x64x32xbf16>,
    %40 = arith.extf %36 : vector<64x32xbf16> to vector<64x32xf32>
    %cst_42 = arith.constant dense<0xFF800000> : vector<32xf32>
    %41 = vector.multi_reduction <maximumf>, %40, %cst_42 [0] : vector<64x32xf32> to vector<32xf32>
    %42 = vector.shape_cast %41 : vector<32xf32> to vector<1x32xf32>
    %c0_43 = arith.constant 0 : index
    %c0_44 = arith.constant 0 : index
    %c0_45 = arith.constant 0 : index
    %43 = vector.load %arg6[%c0_43, %c0_44, %c0_45] : memref<1x1x32xf32, #tpu.memory_space<vmem>>, vector<1x1x32xf32>
    %44 = vector.shape_cast %43 : vector<1x1x32xf32> to vector<1x32xf32>
    %45 = vector.shape_cast %42 : vector<1x32xf32> to vector<1x1x32xf32>
    tpu.vector_store %arg6[%c0_43, %c0_44, %c0_45], %45 {strides = array<i32>} : memref<1x1x32xf32, #tpu.memory_space<vmem>>, vector<1x1x32xf32>,
    return
  }
  func.func @transform_0(%arg0: i32) -> (i32, i32, i32, i32) {
    %c0_i32 = arith.constant 0 : i32
    %c0_i32_0 = arith.constant 0 : i32
    %c0_i32_1 = arith.constant 0 : i32
    %c0_i32_2 = arith.constant 0 : i32
    return %arg0, %c0_i32, %c0_i32_0, %c0_i32_1 : i32, i32, i32, i32
  }
  func.func @transform_1(%arg0: i32) -> (i32, i32) {
    %c0_i32 = arith.constant 0 : i32
    %c0_i32_0 = arith.constant 0 : i32
    %c0_i32_1 = arith.constant 0 : i32
    return %c0_i32, %c0_i32_0 : i32, i32
  }
  func.func @transform_2(%arg0: i32) -> (i32, i32) {
    %c0_i32 = arith.constant 0 : i32
    %c0_i32_0 = arith.constant 0 : i32
    %c0_i32_1 = arith.constant 0 : i32
    return %c0_i32, %c0_i32_0 : i32, i32
  }
  func.func @transform_3(%arg0: i32) -> (i32, i32) {
    %c0_i32 = arith.constant 0 : i32
    %c0_i32_0 = arith.constant 0 : i32
    %c0_i32_1 = arith.constant 0 : i32
    return %c0_i32, %c0_i32_0 : i32, i32
  }
  func.func @transform_4(%arg0: i32) -> (i32, i32, i32) {
    %c0_i32 = arith.constant 0 : i32
    %c0_i32_0 = arith.constant 0 : i32
    %c0_i32_1 = arith.constant 0 : i32
    return %arg0, %c0_i32, %c0_i32_0 : i32, i32, i32
  }
  func.func @transform_5(%arg0: i32) -> (i32, i32, i32) {
    %c0_i32 = arith.constant 0 : i32
    %c0_i32_0 = arith.constant 0 : i32
    %c0_i32_1 = arith.constant 0 : i32
    return %arg0, %c0_i32, %c0_i32_0 : i32, i32, i32
  }
}

module attributes {stable_mosaic.version = 11 : i64} {
  func.func @_fuse_kernel(%arg0: i32, %arg1: i32, %arg2: memref<1x16x128xbf16, #tpu.memory_space<vmem>>, %arg3: memref<1x16x128xbf16, #tpu.memory_space<vmem>>, %arg4: memref<1x1x128xf32, #tpu.memory_space<vmem>>, %arg5: memref<1x16x128xbf16, #tpu.memory_space<vmem>>) attributes {dimension_semantics = [#tpu.dimension_semantics<parallel>, #tpu.dimension_semantics<parallel>], iteration_bounds = array<i64: 2, 1>, scalar_prefetch = 0 : i64, scratch_operands = 0 : i64, tpu.core_type = #tpu.core_type<tc>, window_params = [{transform_indices = @transform_0, window_bounds = array<i64: 1, 16, 128>}, {transform_indices = @transform_1, window_bounds = array<i64: 1, 16, 128>}, {transform_indices = @transform_2, window_bounds = array<i64: 1, 1, 128>}, {transform_indices = @transform_3, window_bounds = array<i64: 1, 16, 128>}]} {
    %c0 = arith.constant 0 : index
    %c0_0 = arith.constant 0 : index
    %c0_1 = arith.constant 0 : index
    %0 = vector.load %arg2[%c0, %c0_0, %c0_1] : memref<1x16x128xbf16, #tpu.memory_space<vmem>>, vector<1x16x128xbf16>
    %1 = vector.shape_cast %0 : vector<1x16x128xbf16> to vector<16x128xbf16>
    %2 = arith.extf %1 : vector<16x128xbf16> to vector<16x128xf32>
    %c0_2 = arith.constant 0 : index
    %c0_3 = arith.constant 0 : index
    %c0_4 = arith.constant 0 : index
    %3 = vector.load %arg4[%c0_2, %c0_3, %c0_4] : memref<1x1x128xf32, #tpu.memory_space<vmem>>, vector<1x1x128xf32>
    %4 = vector.shape_cast %3 : vector<1x1x128xf32> to vector<1x128xf32>
    %5 = vector.broadcast %4 : vector<1x128xf32> to vector<16x128xf32>
    %6 = arith.mulf %2, %5 : vector<16x128xf32>
    %c0_5 = arith.constant 0 : index
    %c0_6 = arith.constant 0 : index
    %c0_7 = arith.constant 0 : index
    %7 = vector.load %arg3[%c0_5, %c0_6, %c0_7] : memref<1x16x128xbf16, #tpu.memory_space<vmem>>, vector<1x16x128xbf16>
    %8 = vector.shape_cast %7 : vector<1x16x128xbf16> to vector<16x128xbf16>
    %9 = arith.extf %8 : vector<16x128xbf16> to vector<16x128xf32>
    %10 = arith.addf %6, %9 : vector<16x128xf32>
    %cst = arith.constant 0.000000e+00 : f32
    %11 = vector.broadcast %cst : f32 to vector<16x128xf32>
    %12 = arith.maximumf %10, %11 : vector<16x128xf32>
    %13 = arith.truncf %12 : vector<16x128xf32> to vector<16x128xbf16>
    %c0_8 = arith.constant 0 : index
    %c0_9 = arith.constant 0 : index
    %c0_10 = arith.constant 0 : index
    %14 = vector.load %arg5[%c0_8, %c0_9, %c0_10] : memref<1x16x128xbf16, #tpu.memory_space<vmem>>, vector<1x16x128xbf16>
    %15 = vector.shape_cast %14 : vector<1x16x128xbf16> to vector<16x128xbf16>
    %16 = vector.shape_cast %13 : vector<16x128xbf16> to vector<1x16x128xbf16>
    tpu.vector_store %arg5[%c0_8, %c0_9, %c0_10], %16 {strides = array<i32>} : memref<1x16x128xbf16, #tpu.memory_space<vmem>>, vector<1x16x128xbf16>,
    return
  }
  func.func @transform_0(%arg0: i32, %arg1: i32) -> (i32, i32, i32) {
    %c0_i32 = arith.constant 0 : i32
    %c0_i32_0 = arith.constant 0 : i32
    return %arg0, %arg1, %c0_i32 : i32, i32, i32
  }
  func.func @transform_1(%arg0: i32, %arg1: i32) -> (i32, i32, i32) {
    %c0_i32 = arith.constant 0 : i32
    %c0_i32_0 = arith.constant 0 : i32
    return %arg0, %arg1, %c0_i32 : i32, i32, i32
  }
  func.func @transform_2(%arg0: i32, %arg1: i32) -> (i32, i32, i32) {
    %c0_i32 = arith.constant 0 : i32
    %c0_i32_0 = arith.constant 0 : i32
    %c0_i32_1 = arith.constant 0 : i32
    return %arg0, %c0_i32, %c0_i32_0 : i32, i32, i32
  }
  func.func @transform_3(%arg0: i32, %arg1: i32) -> (i32, i32, i32) {
    %c0_i32 = arith.constant 0 : i32
    %c0_i32_0 = arith.constant 0 : i32
    return %arg0, %arg1, %c0_i32 : i32, i32, i32
  }
}

</mosaic_0001>

<bundles_post_ra>
// kernel: residual_block_forward.5
= control target key start
LH: loop header
LB: loop body
LE: loop exit
PB: predicated region body
PF: predicated region fallthrough
CT: control target
= control target key end

     0   :  { %s507_s12 = smov 0   ;;  %s509_s13 = smov 0   ;;  %s543_s0 = inlined_call_operand.vmem [shape: bf16[2,16,128], index: 0, kind: input, shape index: {}]   ;;  %s544_s1 = inlined_call_operand.vmem [shape: bf16[2,16,128], index: 1, kind: input, shape index: {}, may-alias: {1,3}]   ;;  %s545_s2 = inlined_call_operand.vmem [shape: f32[2,1,128], index: 2, kind: input, shape index: {}]   ;;  %s546_s3 = inlined_call_operand.vmem [shape: bf16[2,16,128], index: 3, kind: output, shape index: {}, may-alias: {1,3}]  }
   0x1   :  { %s511_s14 = smov 0  }
   0x2 LB: > { %s25_s15 = sadd.s32 1, %s481_s13  ;;  %p409_p0 = scmp.ge.s32.totalorder %s485_s14, 1  ;;  %s485_s14 = sphi %s511_s14, %s13_s14   ;;  %s481_s13 = sphi %s509_s13, %s548_s13   ;;  %s477_s12 = sphi %s507_s12, %s547_s12  }
   0x3   : > { %p27_p1 = scmp.ge.s32.totalorder %s25_s15, 2  ;;  %p183_p2 = scmp.lt.s32.totalorder %s485_s14, 3 }
   0x5   : > { %s550_s15 = smov (%p27_p1, %s25_s15), 0  ;;  %p184_p3 = pnand %p409_p0, %p183_p2 }
   0x6   : > { %p228_p4 = scmp.lt.s32.totalorder (!%p184_p3), %s477_s12, 1 }
   0x7   : > { %187 = sbr.rel (%p184_p3) target bundleno = 27 (0x1b), region = 32 }
   0xc   : > { %s552_s12 = smov (!%p228_p4, %s477_s12), 1 }
   0xd   : > { %s421_s16 = sshll.u32 %s552_s12, 3  ;;  %s249_s19 = scalar_lea.vmem %s545_s2, %s552_s12 }
   0xe   : > { %s235_s22 = scalar_lea.vmem %s543_s0, %s421_s16  ;;  %s245_s25 = scalar_lea.vmem %s544_s1, %s421_s16  ;;  %v416_v1 = vld [vmem:[%s249_s19] ss:$0 sm:$0xff] }
   0xf   : > { %v427_v0 = vld [vmem:[%s235_s22] sm:$0xff]   ;;  %s258_s28 = scalar_lea.vmem %s546_s3, %s421_s16 }
  0x10   : > { %v431_v2 = vld [vmem:[%s245_s25] sm:$0xff]   ;;  %v428_v3 = vunpack.c.l.bf16 %v427_v0  ;;  %v429_v4 = vunpack.c.h.bf16 %v427_v0 }
  0x11   : > { %v432_v5 = vunpack.c.l.bf16 %v431_v2  ;;  %v433_v6 = vunpack.c.h.bf16 %v431_v2 }
  0x12   : > { %v271_v7 = vmul.f32 %v428_v3, %v416_v1  ;;  %v272_v8 = vmul.f32 %v429_v4, %v416_v1 }
  0x14   : > { %v277_v9 = vadd.f32 %v432_v5, %v271_v7  ;;  %v278_v10 = vadd.f32 %v433_v6, %v272_v8 }
  0x16   : > { %v279_v11 = vmax.f32 %v277_v9, 0.0  ;;  %v280_v12 = vmax.f32 %v278_v10, 0.0 }
  0x18   : > { %v437_v13 = vpack.c.bf16 %v280_v12, %v279_v11 }
  0x1a   : > { %438 = vst [vmem:[%s258_s28] sm:$0xff] %v437_v13  }
  0x1b PF: > { %s13_s14 = sadd.s32 1, %s485_s14   ;;  %s547_s12 = smov %s481_s13 }
  0x1c   : > { %p10_p5 = scmp.ge.s32.totalorder %s13_s14, 4   ;;  %s548_s13 = smov %s550_s15 }
  0x1e   :  { %12 = sbr.rel (!%p10_p5) target bundleno = 2 (0x2), region = 68 }

// kernel: residual_block_forward.3
= control target key start
LH: loop header
LB: loop body
LE: loop exit
PB: predicated region body
PF: predicated region fallthrough
CT: control target
= control target key end

     0   :  { %s1839_s27 = smov 0   ;;  %s2307_s0 = inlined_call_operand.vmem [shape: bf16[2,36,9,16], index: 0, kind: input, shape index: {}]   ;;  %s2308_s1 = inlined_call_operand.vmem [shape: bf16[144,32], index: 1, kind: input, shape index: {}]   ;;  %s2309_s2 = inlined_call_operand.vmem [shape: f32[1,32], index: 2, kind: input, shape index: {}]   ;;  %s2310_s3 = inlined_call_operand.vmem [shape: f32[1,32], index: 3, kind: input, shape index: {}]   ;;  %s2311_s4 = inlined_call_operand.vmem [shape: bf16[16,32], index: 4, kind: input, shape index: {}]   ;;  %s2312_s5 = inlined_call_operand.vmem [shape: f32[1,32], index: 5, kind: input, shape index: {}]   ;;  %s2313_s6 = inlined_call_operand.vmem [shape: f32[1,32], index: 6, kind: input, shape index: {}]   ;;  %s2314_s7 = inlined_call_operand.vmem [shape: bf16[2,64,32], index: 7, kind: output, shape index: {0}]   ;;  %s2315_s8 = inlined_call_operand.vmem [shape: bf16[2,64,32], index: 8, kind: output, shape index: {1}]  }
   0x1 LB: > { %s1518_s28 = sadd.s32 4294967295, %s1784_s27   ;;  %p1522_p0 = scmp.ge.s32.totalorder %s1784_s27, 1  ;;  %s1784_s27 = sphi %s1839_s27, %s19_s27  }
   0x2   : > { %p265_p1 = scmp.lt.s32.totalorder %s1784_s27, 3 }
   0x4   : > { %p266_p2 = pnand %p1522_p0, %p265_p1 }
   0x5   : > { %p304_p3 = scmp.lt.s32.totalorder (!%p266_p2), %s1518_s28, 1  ;;  %s1787_s17 = smov (!%p266_p2), 16  }
   0x6   : > { %269 = sbr.rel (%p266_p2) target bundleno = 401 (0x191), region = 48  ;;  %s1788_s18 = smov (!%p266_p2), 48  }
   0x7   : > { %s1789_s21 = smov (!%p266_p2), 64   ;;  %s1790_s30 = smov (!%p266_p2), 32  }
   0x8   : > { %s1791_s13 = smov (!%p266_p2), 80   ;;  %s1792_s15 = smov (!%p266_p2), 96  }
   0x9   : > { %s1793_s16 = smov (!%p266_p2), 112  }
   0xb   : > { %v1760_v0 = vld [vmem:[%s2308_s1 + $0x38] sm:$0xff]   ;;  %s2319_s28 = smov (!%p304_p3, %s1518_s28), 1  ;;  %v1786_v1 = vmov 0   ;;  %v1761_v2 = vld [vmem:[%s2308_s1 + $0x30] sm:$0xff]   ;;  %v1762_v3 = vld [vmem:[%s2308_s1 + $0x28] sm:$0xff]   ;;  %vm948_vm3 = vcmask 130048  }
   0xc   : > { %1103 = vmatprep.subr.bf16.mxu0 %v1786_v1  ;;  %1705 = vmatprep.subr.bf16.mxu1 %v1786_v1  ;;  %s1723_s11 = smul.u32 288, %s2319_s28  ;;  %vm345_vm0 = vsmask.f32 3328  ;;  %vm346_vm1 = vsmask.f32 7440  ;;  %v1764_v16 = vld [vmem:[%s2308_s1 + $0x20] sm:$0xff]  }
   0xd   : > { %1104 = vmatpush1.bf16.msra.mxu0 %v1760_v0  ;;  %1714 = vmatpush1.bf16.msra.mxu1 %v1760_v0  ;;  %v1766_v35 = vld [vmem:[%s2308_s1 + $0x18] sm:$0xff]   ;;  %vm1928_vm2 = vmor %vm345_vm0, %vm346_vm1  ;;  %vm961_vm4 = vcmask 261120   ;;  %vm970_vm5 = vcmask 392192   ;;  %vm979_vm6 = vcmask 523264   ;;  %vm988_vm7 = vcmask 654336   ;;  %s1672_s22 = sshll.u32 %s2319_s28, 5 }
   0xe   : > { %1105 = vmatprep.subr.bf16.mxu0 %v1786_v1  ;;  %1706 = vmatprep.subr.bf16.mxu1 %v1786_v1  ;;  %s1863_s14 = scalar_lea.vmem %s2307_s0, %s1723_s11  ;;  %vm997_vm8 = vcmask 785408   ;;  %vm1006_vm9 = vcmask 916480   ;;  %s2244_s25 = scalar_lea.vmem %s2314_s7, %s1672_s22  ;;  %vm1238_vm10 = vcmask 257024  }
   0xf   : > { %v1740_v4 = vld [vmem:[%s1863_s14 + $0x48] ss:$8 sps:$4 sm:$0xff]   ;;  %v1542_v5 = vld [vmem:[%s1863_s14 + $0xc0] sm:$0xf]  ;;  %v1537_v20 = vld [vmem:[%s1863_s14 + $0x98] sm:$0xf]  ;;  %s2268_s12 = scalar_lea.vmem %s2315_s8, %s1672_s22 }
  0x10   : > { %v1543_v6 = vld [vmem:[%s1863_s14 + $0xc8] sm:$0xf]  ;;  %776 = vrot.lane.b32.xlu0 %v1740_v4, %s1787_s17  ;;  %v571_v10 = vshrl.u32 %v1542_v5, 16  ;;  %v574_v11 = vshll.u32 %v1542_v5, 16  ;;  %v1742_v12 = vld [vmem:[%s1863_s14 + $0x78] ss:$8 sps:$4 sm:$0xff]  }
  0x11   : > { %1106 = vmatpush1.bf16.msra.mxu0 %v1761_v2  ;;  %1715 = vmatpush1.bf16.msra.mxu1 %v1761_v2  ;;  %v585_v7 = vshrl.u32 %v1543_v6, 16  ;;  %v588_v8 = vshll.u32 %v1543_v6, 16  ;;  %v1599_v9 = vcombine.low %v1542_v5, %v1543_v6  ;;  %v1743_v18 = vld [vmem:[%s1863_s14 + $0x108] ss:$8 sps:$4 sm:$0xff]   ;;  %v1889_v23 = vld [vmem:[%s1863_s14] sm:$0xf] }
  0x12   : > { %1107 = vmatprep.subr.bf16.mxu0 %v1786_v1  ;;  %1707 = vmatprep.subr.bf16.mxu1 %v1786_v1  ;;  %v573_v15 = vrot.slane %v571_v10, 4  ;;  %v576_v17 = vrot.slane %v574_v11, 5  ;;  %v1536_v19 = vld [vmem:[%s1863_s14 + $0x90] sm:$0xf]  ;;  %v501_v25 = vshrl.u32 %v1537_v20, 16  ;;  %v504_v26 = vshll.u32 %v1537_v20, 16 }
  0x13   : > { %v1875_v13 = vrot.slane %v585_v7, 4  ;;  %v1877_v14 = vrot.slane %v588_v8, 5  ;;  %830 = vrot.lane.b32.xlu1 %v1599_v9, %s1788_s18  ;;  %v487_v21 = vshrl.u32 %v1536_v19, 16  ;;  %v490_v22 = vshll.u32 %v1536_v19, 16  ;;  %v1893_v28 = vld [vmem:[%s1863_s14 + $0x8] sm:$0xf] }
  0x14   : > { %782 = vrot.lane.b32.xlu0 %v1742_v12, %s1787_s17  ;;  %v577_v24 = vor.u32 %v576_v17, %v573_v15  ;;  %v1596_v27 = vcombine.low %v1536_v19, %v1537_v20  ;;  %v337_v29 = vld [vmem:[%s1863_s14 + $0x4] sm:$0x1]  ;;  %v338_v33 = vld [vmem:[%s1863_s14 + $0xc] sm:$0x1]  ;;  %v349_v34 = vshrl.u32 %v1889_v23, 16  ;;  %v503_v37 = vrot.slane %v501_v25, 4 }
  0x15   : > { %1108 = vmatpush1.bf16.msra.mxu0 %v1762_v3  ;;  %1716 = vmatpush1.bf16.msra.mxu1 %v1762_v3  ;;  %v591_v30 = vor.u32 %v1877_v14, %v1875_v13  ;;  %v489_v31 = vrot.slane %v487_v21, 4  ;;  %v492_v32 = vrot.slane %v490_v22, 5  ;;  %v506_v38 = vrot.slane %v504_v26, 5  ;;  %v1745_v46 = vld [vmem:[%s1863_s14 + $0xd8] ss:$8 sps:$4 sm:$0xff]   ;;  %v1767_v4 = vld [vmem:[%s2308_s1 + $0x10] sm:$0xff]  }
  0x16   : > { %1109 = vmatprep.subr.bf16.mxu0 %v1786_v1  ;;  %1708 = vmatprep.subr.bf16.mxu1 %v1786_v1  ;;  %v1904_v36 = vrot.slane %v577_v24, 4  ;;  %v352_v39 = vshll.u32 %v1889_v23, 16  ;;  %v351_v40 = vrot.slane %v349_v34, 4  ;;  %v358_v41 = vshll.u32 %v337_v29, 16  ;;  %v1914_v47 = vld [vmem:[%s1863_s14 + $0x30] sm:$0xf] }
  0x17   : > { %858 = vrot.lane.b32.xlu1 %v1743_v18, %s1789_s21  ;;  %v363_v42 = vshrl.u32 %v1893_v28, 16  ;;  %v366_v43 = vshll.u32 %v1893_v28, 16  ;;  %v372_v45 = vshll.u32 %v338_v33, 16  ;;  %v493_v48 = vor.u32 %v492_v32, %v489_v31  ;;  %v1917_v53 = vld [vmem:[%s1863_s14 + $0x38] sm:$0xf]  ;;  %v1769_v13 = vld [vmem:[%s2308_s1] sm:$0xff]  }
  0x18   : > { %824 = vrot.lane.b32.xlu0 %v1596_v27, %s1788_s18  ;;  %v354_v44 = vrot.slane %v352_v39, 5  ;;  %v507_v49 = vor.u32 %v506_v38, %v503_v37  ;;  %v360_v50 = vrot.slane %v358_v41, 5  ;;  %v433_v54 = vshrl.u32 %v1914_v47, 16  ;;  %v343_v57 = vld [vmem:[%s1863_s14 + $0x34] sm:$0x1]  ;;  %v1768_v27 = vld [vmem:[%s2308_s1 + $0x8] sm:$0xff]  }
  0x19   : > { %1110 = vmatpush1.bf16.msra.mxu0 %v1764_v16  ;;  %1717 = vmatpush1.bf16.msra.mxu1 %v1764_v16  ;;  %v365_v51 = vrot.slane %v363_v42, 4  ;;  %v368_v52 = vrot.slane %v366_v43, 5  ;;  %v374_v56 = vrot.slane %v372_v45, 5  ;;  %v344_v58 = vld [vmem:[%s1863_s14 + $0x3c] sm:$0x1]  ;;  %v436_v59 = vshll.u32 %v1914_v47, 16 }
  0x1a   : > { %1111 = vmatprep.subr.bf16.mxu0 %v1786_v1  ;;  %1709 = vmatprep.subr.bf16.mxu1 %v1786_v1  ;;  %v355_v55 = vor.u32 %v354_v44, %v351_v40  ;;  %v1584_v60 = vcombine.low %v1889_v23, %v1893_v28  ;;  %v435_v63 = vrot.slane %v433_v54, 4  ;;  %v442_v0 = vshll.u32 %v343_v57, 16  ;;  %v1552_v3 = vld [vmem:[%s1863_s14 + $0x94] sm:$0x1]  ;;  %v1553_v9 = vld [vmem:[%s1863_s14 + $0x9c] sm:$0x1] }
  0x1b   : > { %v369_v62 = vor.u32 %v368_v52, %v365_v51  ;;  %v447_v2 = vshrl.u32 %v1917_v53, 16  ;;  %v438_v6 = vrot.slane %v436_v59, 5  ;;  %v450_v7 = vshll.u32 %v1917_v53, 16  ;;  %v1558_v16 = vld [vmem:[%s1863_s14 + $0xc4] sm:$0x1] }
  0x1c   : > { %852 = vrot.lane.b32.xlu0 %v1745_v46, %s1789_s21  ;;  %v356_v5 = vrot.slane %v355_v55, 4  ;;  %v456_v8 = vshll.u32 %v344_v58, 16  ;;  %v444_v11 = vrot.slane %v442_v0, 5  ;;  %v494_v15 = vrot.slane %v493_v48, 4  ;;  %v1559_v21 = vld [vmem:[%s1863_s14 + $0xcc] sm:$0x1] }
  0x1d   : > { %1112 = vmatpush1.bf16.msra.mxu0 %v1766_v35  ;;  %1718 = vmatpush1.bf16.msra.mxu1 %v1766_v35  ;;  %v370_v10 = vrot.slane %v369_v62, 4  ;;  %v449_v12 = vrot.slane %v447_v2, 4  ;;  %v439_v18 = vor.u32 %v438_v6, %v435_v63  ;;  %v452_v19 = vrot.slane %v450_v7, 5  ;;  %v1560_v34 = vld [vmem:[%s1863_s14 + $0x8] sm:$0xf]  ;;  %v1770_v52 = vld [vmem:[%s2308_s1 + $0x40] sm:$0xff]  }
  0x1e   : > { %1113 = vmatprep.subr.bf16.mxu0 %v1786_v1  ;;  %1710 = vmatprep.subr.bf16.mxu1 %v1786_v1  ;;  %v361_v17 = vsel %vm1928_vm2, %v356_v5, %v360_v50  ;;  %v458_v20 = vrot.slane %v456_v8, 5  ;;  %v496_v24 = vshll.u32 %v1552_v3, 16  ;;  %v508_v25 = vrot.slane %v507_v49, 4  ;;  %v1561_v45 = vld [vmem:[%s1863_s14 + $0x10] sm:$0xf] }
  0x1f   : > { %v375_v22 = vsel %vm1928_vm2, %v370_v10, %v374_v56  ;;  %v510_v26 = vshll.u32 %v1553_v9, 16  ;;  %v440_v31 = vrot.slane %v439_v18, 4  ;;  %v453_v32 = vor.u32 %v452_v19, %v449_v12  ;;  %v1975_v51 = vld [vmem:[%s1863_s14 + $0x38] sm:$0xf]  ;;  %v1986_v59 = vld [vmem:[%s1863_s14 + $0x40] sm:$0xf] }
  0x20   : > { %v1592_v29 = vcombine.low %v361_v17, %v375_v22  ;;  %v580_v33 = vshll.u32 %v1558_v16, 16  ;;  %v592_v35 = vrot.slane %v591_v30, 4  ;;  %v498_v37 = vrot.slane %v496_v24, 5  ;;  %v1989_v62 = vld [vmem:[%s1863_s14 + $0x10] sm:$0xf] }
  0x21   : > { %1114 = vmatpush1.bf16.msra.mxu0 %v1767_v4  ;;  %1719 = vmatpush1.bf16.msra.mxu1 %v1767_v4  ;;  %v512_v38 = vrot.slane %v510_v26, 5  ;;  %v594_v39 = vshll.u32 %v1559_v21, 16  ;;  %v445_v40 = vsel %vm1928_vm2, %v440_v31, %v444_v11  ;;  %v454_v41 = vrot.slane %v453_v32, 4  ;;  %v1997_v4 = vld [vmem:[%s1863_s14 + $0x18] sm:$0xf] }
  0x22   : > { %1115 = vmatprep.subr.bf16.mxu0 %v1786_v1  ;;  %1711 = vmatprep.subr.bf16.mxu1 %v1786_v1  ;;  %v582_v42 = vrot.slane %v580_v33, 5  ;;  %v625_v43 = vshrl.u32 %v1560_v34, 16  ;;  %v499_v14 = vsel %vm1928_vm2, %v494_v15, %v498_v37  ;;  %v628_v46 = vshll.u32 %v1560_v34, 16  ;;  %v1748_v7 = vld [vmem:[%s1863_s14 + $0x50] ss:$8 sps:$4 sm:$0xff]  }
  0x23   : > { %796 = vrot.lane.b32.xlu1 %v1592_v29, %s1790_s30  ;;  %v513_v30 = vsel %vm1928_vm2, %v508_v25, %v512_v38  ;;  %v596_v44 = vrot.slane %v594_v39, 5  ;;  %v459_v48 = vsel %vm1928_vm2, %v454_v41, %v458_v20  ;;  %v639_v56 = vshrl.u32 %v1561_v45, 16  ;;  %v339_v8 = vld [vmem:[%s1863_s14 + $0x14] sm:$0x1]  ;;  %v340_v9 = vld [vmem:[%s1863_s14 + $0x1c] sm:$0x1] }
  0x24   : > { %v1604_v49 = vcombine.low %v499_v14, %v513_v30  ;;  %v583_v50 = vsel %vm1928_vm2, %v1904_v36, %v582_v42  ;;  %v1595_v54 = vcombine.low %v445_v40, %v459_v48  ;;  %v642_v57 = vshll.u32 %v1561_v45, 16  ;;  %v2016_v17 = vld [vmem:[%s1863_s14 + $0xa0] sm:$0xf]  ;;  %v1539_v21 = vld [vmem:[%s1863_s14 + $0xa8] sm:$0xf] }
  0x25   : > { %1116 = vmatpush1.bf16.msra.mxu0 %v1768_v27  ;;  %1720 = vmatpush1.bf16.msra.mxu1 %v1768_v27  ;;  %v597_v55 = vsel %vm1928_vm2, %v592_v35, %v596_v44  ;;  %v1983_v36 = vrot.slane %v625_v43, 4  ;;  %v1608_v58 = vcombine.low %v1560_v34, %v1561_v45  ;;  %v1992_v0 = vrot.slane %v628_v46, 5  ;;  %v1750_v33 = vld [vmem:[%s1863_s14 + $0x58] ss:$8 sps:$4 sm:$0xff]   ;;  %v1554_v42 = vld [vmem:[%s1863_s14 + $0xa4] sm:$0x1] }
  0x26   : > { %1117 = vmatprep.subr.bf16.mxu0 %v1786_v1  ;;  %1712 = vmatprep.subr.bf16.mxu1 %v1786_v1  ;;  %v1607_v63 = vcombine.low %v583_v50, %v597_v55  ;;  %v709_v2 = vshrl.u32 %v1975_v51, 16  ;;  %v712_v3 = vshll.u32 %v1975_v51, 16  ;;  %v2000_v5 = vrot.slane %v639_v56, 4  ;;  %v1555_v43 = vld [vmem:[%s1863_s14 + $0xac] sm:$0x1]  ;;  %v2035_v46 = vld [vmem:[%s2311_s4] sm:$0xff]  }
  0x27   : > { %872 = vrot.lane.b32.xlu0 %v1604_v49, %s1791_s13  ;;  %802 = vrot.lane.b32.xlu1 %v1595_v54, %s1790_s30  ;;  %v2002_v6 = vrot.slane %v642_v57, 5  ;;  %v1587_v10 = vcombine.low %v1914_v47, %v1917_v53  ;;  %v723_v11 = vshrl.u32 %v1986_v59, 16  ;;  %v1611_v12 = vcombine.low %v1975_v51, %v1986_v59 }
  0x28   : > { %v377_v15 = vshrl.u32 %v1989_v62, 16  ;;  %v380_v16 = vshll.u32 %v1989_v62, 16  ;;  %v386_v18 = vshll.u32 %v339_v8, 16  ;;  %v391_v19 = vshrl.u32 %v1997_v4, 16 }
  0x29   : > { %1118 = vmatpush1.bf16.msra.mxu0 %v1769_v13  ;;  %1721 = vmatpush1.bf16.msra.mxu1 %v1769_v13  ;;  %v400_v20 = vshll.u32 %v340_v9, 16  ;;  %v515_v25 = vshrl.u32 %v2016_v17, 16  ;;  %v518_v26 = vshll.u32 %v2016_v17, 16  ;;  %v726_v27 = vshll.u32 %v1986_v59, 16  ;;  %v1749_v13 = vld [vmem:[%s1863_s14 + $0x80] ss:$8 sps:$4 sm:$0xff]  }
  0x2a   : > { %1133 = vmatprep.subr.bf16.mxu0 %v1786_v1  ;;  %1713 = vmatprep.subr.bf16.mxu1 %v1786_v1  ;;  %v394_v1 = vshll.u32 %v1997_v4, 16  ;;  %v379_v22 = vrot.slane %v377_v15, 4  ;;  %v382_v24 = vrot.slane %v380_v16, 5  ;;  %v388_v29 = vrot.slane %v386_v18, 5  ;;  %v2062_v18 = vld [vmem:[%s1863_s14 + $0x20] sm:$0xf] }
  0x2b   : > { %900 = vrot.lane.b32.xlu0 %v1608_v58, %s1792_s15  ;;  %878 = vrot.lane.b32.xlu1 %v1607_v63, %s1791_s13  ;;  %v393_v31 = vrot.slane %v391_v19, 4  ;;  %v517_v35 = vrot.slane %v515_v25, 4  ;;  %v520_v37 = vrot.slane %v518_v26, 5  ;;  %v529_v38 = vshrl.u32 %v1539_v21, 16  ;;  %v2043_v58 = vld [vmem:[%s1863_s14 + $0x18] sm:$0xf] }
  0x2c   : > { %v396_v32 = vrot.slane %v394_v1, 5  ;;  %v383_v34 = vor.u32 %v382_v24, %v379_v22  ;;  %v402_v40 = vrot.slane %v400_v20, 5  ;;  %v532_v41 = vshll.u32 %v1539_v21, 16  ;;  %v2065_v19 = vld [vmem:[%s1863_s14 + $0x20] sm:$0xf] }
  0x2d   : > { %1134 = vmatpush2.bf16.msra.mxu0 %v1770_v52  ;;  %1722 = vmatpush2.bf16.msra.mxu1 %v1770_v52  ;;  %v531_v30 = vrot.slane %v529_v38, 4  ;;  %v521_v44 = vor.u32 %v520_v37, %v517_v35  ;;  %v524_v45 = vshll.u32 %v1554_v42, 16  ;;  %v2037_v48 = vrot.slane %v709_v2, 4  ;;  %v1752_v1 = vld [vmem:[%s1863_s14 + $0xe8] ss:$8 sps:$4 sm:$0xff]  }
  0x2e   : > { %v397_v39 = vor.u32 %v396_v32, %v393_v31  ;;  %v384_v14 = vrot.slane %v383_v34, 4  ;;  %v534_v50 = vrot.slane %v532_v41, 5  ;;  %v538_v52 = vshll.u32 %v1555_v43, 16  ;;  %1695 = vmatprep.subr.bf16.mxu1 %v2035_v46  ;;  %v342_v24 = vld [vmem:[%s1863_s14 + $0x2c] sm:$0x1] }
  0x2f   : > { %928 = vrot.lane.b32.xlu0 %v1748_v7, %s1793_s16  ;;  %906 = vrot.lane.b32.xlu1 %v1611_v12, %s1792_s15  ;;  %v1597_v55 = vcombine.low %v2016_v17, %v1539_v21  ;;  %v522_v56 = vrot.slane %v521_v44, 4  ;;  %v526_v57 = vrot.slane %v524_v45, 5  ;;  %v653_v7 = vshrl.u32 %v2043_v58, 16  ;;  %v1754_v37 = vld [vmem:[%s1863_s14 + $0x60] ss:$8 sps:$4 sm:$0xff]  }
  0x30   : > { %v398_v49 = vrot.slane %v397_v39, 4  ;;  %v389_v54 = vsel %vm1928_vm2, %v384_v14, %v388_v29  ;;  %v535_v63 = vor.u32 %v534_v50, %v531_v30  ;;  %v540_v2 = vrot.slane %v538_v52, 5 }
  0x31   : > { %v2052_v8 = vrot.slane %v712_v3, 5  ;;  %v2054_v9 = vrot.slane %v723_v11, 4  ;;  %v2057_v15 = vrot.slane %v726_v27, 5  ;;  %v527_v16 = vsel %vm1928_vm2, %v522_v56, %v526_v57  ;;  %v2070_v3 = vld [vmem:[%s1863_s14 + $0x28] sm:$0xf] }
  0x32   : > { %v403_v59 = vsel %vm1928_vm2, %v398_v49, %v402_v40  ;;  %v536_v17 = vrot.slane %v535_v63, 4  ;;  %v656_v51 = vshll.u32 %v2043_v58, 16  ;;  %v341_v11 = vld [vmem:[%s1863_s14 + $0x24] sm:$0x1]  ;;  %v405_v20 = vshrl.u32 %v2065_v19, 16 }
  0x33   : > { %778 = vrot.lane.b32.xlu0 %v1750_v33, %s1787_s17  ;;  %934 = vrot.lane.b32.xlu1 %v1749_v13, %s1793_s16  ;;  %v1593_v12 = vcombine.low %v389_v54, %v403_v59  ;;  %v2077_v22 = vrot.slane %v653_v7, 4  ;;  %v408_v25 = vshll.u32 %v2065_v19, 16  ;;  %v414_v26 = vshll.u32 %v341_v11, 16  ;;  %v2085_v33 = vld [vmem:[%s1863_s14 + $0xb0] sm:$0xf] }
  0x34   : > { %v541_v21 = vsel %vm1928_vm2, %v536_v17, %v540_v2  ;;  %v667_v29 = vshrl.u32 %v2062_v18, 16  ;;  %v407_v31 = vrot.slane %v405_v20, 4  ;;  %v419_v32 = vshrl.u32 %v2070_v3, 16  ;;  %v2093_v40 = vld [vmem:[%s1863_s14 + $0xb8] sm:$0xf] }
  0x35   : > { %v1605_v27 = vcombine.low %v527_v16, %v541_v21  ;;  %v670_v34 = vshll.u32 %v2062_v18, 16  ;;  %v1609_v35 = vcombine.low %v2043_v58, %v2062_v18  ;;  %v410_v38 = vrot.slane %v408_v25, 5  ;;  %v1556_v58 = vld [vmem:[%s1863_s14 + $0xb4] sm:$0x1]  ;;  %v1557_v59 = vld [vmem:[%s1863_s14 + $0xbc] sm:$0x1] }
  0x36   : > { %v422_v39 = vshll.u32 %v2070_v3, 16  ;;  %v421_v41 = vrot.slane %v419_v32, 4  ;;  %v428_v42 = vshll.u32 %v342_v24, 16  ;;  %v543_v43 = vshrl.u32 %v2085_v33, 16  ;;  %v2104_v16 = vld [vmem:[%s1863_s14 + $0x28] sm:$0xf] }
  0x37   : > { %826 = vrot.lane.b32.xlu0 %v1597_v55, %s1788_s18  ;;  %798 = vrot.lane.b32.xlu1 %v1593_v12, %s1790_s30  ;;  %v546_v13 = vshll.u32 %v2085_v33, 16  ;;  %v411_v14 = vor.u32 %v410_v38, %v407_v31  ;;  %v416_v30 = vrot.slane %v414_v26, 5  ;;  %v557_v45 = vshrl.u32 %v2093_v40, 16  ;;  %v1755_v17 = vld [vmem:[%s1863_s14 + $0x68] ss:$8 sps:$4 sm:$0xff]  }
  0x38   : > { %v424_v44 = vrot.slane %v422_v39, 5  ;;  %v430_v49 = vrot.slane %v428_v42, 5  ;;  %v545_v50 = vrot.slane %v543_v43, 4  ;;  %v560_v54 = vshll.u32 %v2093_v40, 16  ;;  %v1565_v11 = vld [vmem:[%s1863_s14 + $0x30] sm:$0xf] }
  0x39   : > { %v548_v52 = vrot.slane %v546_v13, 5  ;;  %v412_v55 = vrot.slane %v411_v14, 4  ;;  %v559_v57 = vrot.slane %v557_v45, 4  ;;  %v552_v7 = vshll.u32 %v1556_v58, 16  ;;  %v1577_v45 = vld [vmem:[%s1863_s14 + $0x14] sm:$0x1] }
  0x3a   : > { %v425_v56 = vor.u32 %v424_v44, %v421_v41  ;;  %v562_v63 = vrot.slane %v560_v54, 5  ;;  %v566_v12 = vshll.u32 %v1557_v59, 16  ;;  %v681_v20 = vshrl.u32 %v2104_v16, 16  ;;  %v1576_v44 = vld [vmem:[%s1863_s14 + $0xc] sm:$0x1] }
  0x3b   : > { %874 = vrot.lane.b32.xlu0 %v1605_v27, %s1791_s13  ;;  %854 = vrot.lane.b32.xlu1 %v1752_v1, %s1789_s21  ;;  %v549_v2 = vor.u32 %v548_v52, %v545_v50  ;;  %v417_v18 = vsel %vm1928_vm2, %v412_v55, %v416_v30  ;;  %v554_v24 = vrot.slane %v552_v7, 5  ;;  %v684_v26 = vshll.u32 %v2104_v16, 16  ;;  %v1582_v55 = vld [vmem:[%s1863_s14 + $0x3c] sm:$0x1] }
  0x3c   : > { %v426_v1 = vrot.slane %v425_v56, 4  ;;  %v563_v25 = vor.u32 %v562_v63, %v559_v57  ;;  %v658_v27 = vrot.slane %v656_v51, 5  ;;  %v568_v32 = vrot.slane %v566_v12, 5 }
  0x3d   : > { %v550_v21 = vrot.slane %v549_v2, 4  ;;  %v669_v38 = vrot.slane %v667_v29, 4  ;;  %v672_v39 = vrot.slane %v670_v34, 5  ;;  %v1598_v43 = vcombine.low %v2085_v33, %v2093_v40 }
  0x3e   : > { %v431_v31 = vsel %vm1928_vm2, %v426_v1, %v430_v49  ;;  %v564_v42 = vrot.slane %v563_v25, 4  ;;  %v631_v13 = vor.u32 %v1992_v0, %v1983_v36  ;;  %v645_v51 = vor.u32 %v2002_v6, %v2000_v5  ;;  %v1578_v25 = vld [vmem:[%s1863_s14 + $0x1c] sm:$0x1] }
  0x3f   : > { %930 = vrot.lane.b32.xlu0 %v1754_v37, %s1793_s16  ;;  %902 = vrot.lane.b32.xlu1 %v1609_v35, %s1792_s15  ;;  %v695_v37 = vshrl.u32 %v1565_v11, 16  ;;  %v1594_v41 = vcombine.low %v417_v18, %v431_v31  ;;  %v1757_v35 = vld [vmem:[%s1863_s14 + $0xf8] ss:$8 sps:$4 sm:$0xff]   ;;  %v555_v29 = vsel %vm1928_vm2, %v550_v21, %v554_v24  ;;  %v683_v34 = vrot.slane %v681_v20, 4 }
  0x40   : > { %v686_v14 = vrot.slane %v684_v26, 5  ;;  %v715_v33 = vor.u32 %v2052_v8, %v2037_v48  ;;  %v569_v40 = vsel %vm1928_vm2, %v564_v42, %v568_v32  ;;  %v698_v0 = vshll.u32 %v1565_v11, 16  ;;  %v1579_v26 = vld [vmem:[%s1863_s14 + $0x24] sm:$0x1] }
  0x41   : > { %v697_v36 = vrot.slane %v695_v37, 4  ;;  %v729_v5 = vor.u32 %v2057_v15, %v2054_v9  ;;  %v659_v6 = vor.u32 %v658_v27, %v2077_v22  ;;  %v673_v30 = vor.u32 %v672_v39, %v669_v38  ;;  %v1583_v22 = vld [vmem:[%s1863_s14 + $0x44] sm:$0x1] }
  0x42   : > { %v1585_v49 = vcombine.low %v1989_v62, %v1997_v4  ;;  %v1586_v48 = vcombine.low %v2065_v19, %v2070_v3  ;;  %v632_v8 = vrot.slane %v631_v13, 4  ;;  %v634_v50 = vshll.u32 %v1576_v44, 16 }
  0x43   : > { %780 = vrot.lane.b32.xlu1 %v1755_v17, %s1787_s17  ;;  %800 = vrot.lane.b32.xlu0 %v1594_v41, %s1790_s30  ;;  %v646_v52 = vrot.slane %v645_v51, 4  ;;  %v648_v54 = vshll.u32 %v1577_v45, 16  ;;  %v1606_v9 = vcombine.low %v555_v29, %v569_v40  ;;  %v1610_v15 = vcombine.low %v2104_v16, %v1565_v11  ;;  %v1759_v17 = vld [vmem:[%s1863_s14 + $0x70] ss:$8 sps:$4 sm:$0xff]   ;;  %v1581_v29 = vld [vmem:[%s1863_s14 + $0x34] sm:$0x1] }
  0x44   : > { %v716_v56 = vrot.slane %v715_v33, 4  ;;  %v718_v57 = vshll.u32 %v1582_v55, 16  ;;  %v636_v58 = vrot.slane %v634_v50, 5  ;;  %v730_v63 = vrot.slane %v729_v5, 4 }
  0x45   : > { %v650_v59 = vrot.slane %v648_v54, 5  ;;  %v732_v2 = vshll.u32 %v1583_v22, 16  ;;  %v700_v7 = vrot.slane %v698_v0, 5  ;;  %v660_v11 = vrot.slane %v659_v6, 4 }
  0x46   : > { %v720_v12 = vrot.slane %v718_v57, 5  ;;  %v637_v18 = vsel %vm1928_vm2, %v632_v8, %v636_v58  ;;  %v674_v20 = vrot.slane %v673_v30, 4  ;;  %v687_v27 = vor.u32 %v686_v14, %v683_v34 }
  0x47   : > { %828 = vrot.lane.b32.xlu1 %v1598_v43, %s1788_s18  ;;  %856 = vrot.lane.b32.xlu0 %v1757_v35, %s1789_s21  ;;  %v651_v1 = vsel %vm1928_vm2, %v646_v52, %v650_v59  ;;  %v734_v16 = vrot.slane %v732_v2, 5  ;;  %v662_v32 = vshll.u32 %v1578_v25, 16  ;;  %v676_v37 = vshll.u32 %v1579_v26, 16  ;;  %v1580_v43 = vld [vmem:[%s1863_s14 + $0x2c] sm:$0x1] }
  0x48   : > { %v1616_v21 = vcombine.low %v637_v18, %v651_v1  ;;  %v721_v24 = vsel %vm1928_vm2, %v716_v56, %v720_v12  ;;  %v701_v38 = vor.u32 %v700_v7, %v697_v36  ;;  %v688_v35 = vrot.slane %v687_v27, 4  ;;  %v1773_v18 = vld [vmem:[%s1863_s14 + $0xd8] ss:$8 sps:$4 sm:$0xff]   ;;  %v1774_v27 = vld [vmem:[%s1863_s14 + $0xe8] ss:$8 sps:$4 sm:$0xff]  }
  0x49   : > { %v735_v31 = vsel %vm1928_vm2, %v730_v63, %v734_v16  ;;  %v664_v41 = vrot.slane %v662_v32, 5  ;;  %v678_v42 = vrot.slane %v676_v37, 5  ;;  %v690_v34 = vshll.u32 %v1580_v43, 16  ;;  %v1776_v32 = vld [vmem:[%s1863_s14 + $0xf8] ss:$8 sps:$4 sm:$0xff]  }
  0x4a   : > { %1629 = vmatprep.mubr.msk.bf16.mxu0 %vm948_vm3, %v1616_v21  ;;  %v1619_v39 = vcombine.low %v721_v24, %v735_v31  ;;  %v702_v14 = vrot.slane %v701_v38, 4  ;;  %v704_v40 = vshll.u32 %v1581_v29, 16 }
  0x4b   : > { %876 = vrot.lane.b32.xlu1 %v1606_v9, %s1791_s13  ;;  %904 = vrot.lane.b32.xlu0 %v1610_v15, %s1792_s15  ;;  %v665_v13 = vsel %vm1928_vm2, %v660_v11, %v664_v41  ;;  %v679_v51 = vsel %vm1928_vm2, %v674_v20, %v678_v42  ;;  %v692_v36 = vrot.slane %v690_v34, 5  ;;  %v1777_v41 = vld [vmem:[%s1863_s14 + $0x108] ss:$8 sps:$4 sm:$0xff]  }
  0x4c   : > { %1632 = vmatprep.mubr.msk.bf16.mxu1 %vm948_vm3, %v1619_v39  ;;  %v1617_v33 = vcombine.low %v665_v13, %v679_v51  ;;  %v706_v0 = vrot.slane %v704_v40, 5 }
  0x4d   : > { %v693_v5 = vsel %vm1928_vm2, %v688_v35, %v692_v36 }
  0x4e   : > { %v707_v6 = vsel %vm1928_vm2, %v702_v14, %v706_v0  ;;  %v2228_v0 = vld [vmem:[%s2309_s2] ss:$0 sm:$0xff] }
  0x4f   : > { %932 = vrot.lane.b32.xlu1 %v1759_v17, %s1793_s16  ;;  %v2171_v30 = vcombine.low %v693_v5, %v707_v6  ;;  %v2233_v6 = vld [vmem:[%s2310_s3] ss:$0 sm:$0xff] }
  0x82   : > { %v777_v44 = vpop.permute.xlu0 %776 }
  0x83   : > { %v951_v9 = vsel %vm948_vm3, %v1584_v60, %v777_v44 }
  0x85   : > { %v831_v8 = vpop.permute.xlu1 %830 }
  0x86   : > { %v783_v45 = vpop.permute.xlu0 %782 }
  0x87   : > { %v960_v56 = vsel %vm948_vm3, %v1587_v10, %v783_v45 }
  0x89   : > { %v859_v52 = vpop.permute.xlu1 %858 }
  0x8a   : > { %v825_v50 = vpop.permute.xlu0 %824 }
  0x8e   : > { %v853_v54 = vpop.permute.xlu0 %852 }
  0x95   : > { %v797_v55 = vpop.permute.xlu1 %796 }
  0x96   : > { %v963_v15 = vsel %vm961_vm4, %v951_v9, %v797_v55 }
  0x97   : > { %v972_v57 = vsel %vm970_vm5, %v963_v15, %v825_v50 }
  0x98   : > { %v981_v28 = vsel %vm979_vm6, %v972_v57, %v853_v54 }
  0x99   : > { %v873_v61 = vpop.permute.xlu0 %872  ;;  %v803_v22 = vpop.permute.xlu1 %802 }
  0x9a   : > { %v969_v58 = vsel %vm961_vm4, %v960_v56, %v803_v22  ;;  %v990_v63 = vsel %vm988_vm7, %v981_v28, %v873_v61 }
  0x9b   : > { %v978_v60 = vsel %vm970_vm5, %v969_v58, %v831_v8 }
  0x9c   : > { %v987_v10 = vsel %vm979_vm6, %v978_v60, %v859_v52 }
  0x9d   : > { %v901_v59 = vpop.permute.xlu0 %900  ;;  %v879_v23 = vpop.permute.xlu1 %878 }
  0x9e   : > { %v999_v47 = vsel %vm997_vm8, %v990_v63, %v901_v59  ;;  %v996_v12 = vsel %vm988_vm7, %v987_v10, %v879_v23  ;;  %v1660_v63 = vld [vmem:[%s2312_s5] ss:$0 sm:$0xff] }
  0xa1   : > { %v929_v53 = vpop.permute.xlu0 %928  ;;  %v907_v2 = vpop.permute.xlu1 %906 }
  0xa2   : > { %v1008_v7 = vsel %vm1006_vm9, %v999_v47, %v929_v53  ;;  %v1005_v1 = vsel %vm997_vm8, %v996_v12, %v907_v2  ;;  %v1661_v2 = vld [vmem:[%s2313_s6] ss:$0 sm:$0xff] }
  0xa3   : > { %1136 = vmatmul.mubr.bf16.vlgmr.msra.gmra.mxu0 %v1008_v7 }
  0xa4   : > { %1630 = vmatprep.mubr.msk.bf16.mxu0 %vm948_vm3, %v1617_v33 }
  0xa5   : > { %v779_v17 = vpop.permute.xlu0 %778  ;;  %v935_v16 = vpop.permute.xlu1 %934 }
  0xa6   : > { %v1017_v11 = vsel %vm1006_vm9, %v1005_v1, %v935_v16  ;;  %v954_v20 = vsel %vm948_vm3, %v1585_v49, %v779_v17 }
  0xa7   : > { %1160 = vmatmul.mubr.bf16.vlgmr.msra.gmra.mxu1 %v1017_v11 }
  0xa8   : > { %1696 = vmatpush3.bf16.msra.mxu1 %v2035_v46  ;;  %1697 = vmatprep.mubr.msk.bf16.mxu1 %vm948_vm3, %v1773_v18 }
  0xa9   : > { %v827_v21 = vpop.permute.xlu0 %826  ;;  %v799_v24 = vpop.permute.xlu1 %798 }
  0xaa   : > { %v965_v25 = vsel %vm961_vm4, %v954_v20, %v799_v24 }
  0xab   : > { %v974_v26 = vsel %vm970_vm5, %v965_v25, %v827_v21 }
  0xad   : > { %v875_v31 = vpop.permute.xlu0 %874  ;;  %v855_v37 = vpop.permute.xlu1 %854 }
  0xae   : > { %v983_v38 = vsel %vm979_vm6, %v974_v26, %v855_v37 }
  0xaf   : > { %v992_v62 = vsel %vm988_vm7, %v983_v38, %v875_v31  ;;  %1698 = vmatmul.mubr.msk.bf16.vlgmr.msra.gmra.mxu1 %vm948_vm3, %v1774_v27 }
  0xb0   : > { %1701 = vmatprep.mubr.msk.bf16.mxu1 %vm948_vm3, %v1776_v32 }
  0xb1   : > { %v931_v4 = vpop.permute.xlu0 %930  ;;  %v903_v46 = vpop.permute.xlu1 %902 }
  0xb2   : > { %v1001_v49 = vsel %vm997_vm8, %v992_v62, %v903_v46 }
  0xb3   : > { %v1011_v39 = vsel %vm1006_vm9, %v1001_v49, %v931_v4 }
  0xb4   : > { %1144 = vmatmul.mubr.bf16.gmra.mxu0 %v1011_v39 }
  0xb5   : > { %v781_v42 = vpop.permute.xlu1 %780  ;;  %v801_v43 = vpop.permute.xlu0 %800  ;;  %1631 = vmatprep.mubr.msk.bf16.mxu0 %vm948_vm3, %v2171_v30 }
  0xb6   : > { %v957_v35 = vsel %vm948_vm3, %v1586_v48, %v781_v42 }
  0xb7   : > { %v967_v13 = vsel %vm961_vm4, %v957_v35, %v801_v43  ;;  %1702 = vmatmul.mubr.msk.bf16.gmra.mxu1 %vm948_vm3, %v1777_v41 }
  0xb9   : > { %v829_v51 = vpop.permute.xlu1 %828  ;;  %v857_v29 = vpop.permute.xlu0 %856 }
  0xba   : > { %v976_v34 = vsel %vm970_vm5, %v967_v13, %v829_v51 }
  0xbb   : > { %v985_v14 = vsel %vm979_vm6, %v976_v34, %v857_v29 }
  0xbd   : > { %v877_v33 = vpop.permute.xlu1 %876  ;;  %v905_v40 = vpop.permute.xlu0 %904 }
  0xbe   : > { %v994_v36 = vsel %vm988_vm7, %v985_v14, %v877_v33 }
  0xbf   : > { %v1003_v19 = vsel %vm997_vm8, %v994_v36, %v905_v40 }
  0xc1   : > { %v933_v3 = vpop.permute.xlu1 %932 }
  0xc2   : > { %v1014_v48 = vsel %vm1006_vm9, %v1003_v19, %v933_v3 }
  0xc3   : > { %1152 = vmatmul.mubr.bf16.gmra.mxu0 %v1014_v48 }
 0x163   : > { %v1137_v5 = vpop.f32.mrf.mxu0 }
 0x164   : > { %v1175_v30 = vmul.f32 %v2228_v0, %v1137_v5 }
 0x165   : > { %v1139_v44 = vpop.f32.mrf.mxu0 }
 0x166   : > { %v1190_v45 = vadd.f32 %v2233_v6, %v1175_v30 }
 0x167   : > { %v1140_v8 = vpop.f32.mrf.mxu0  ;;  %v1161_v52 = vpop.f32.mrf.mxu1 }
 0x168   : > { %v1198_v50 = vmax.f32 %v1190_v45, 0.0  ;;  %v1176_v54 = vmul.f32 %v2228_v0, %v1140_v8  ;;  %v1181_v55 = vmul.f32 %v2228_v0, %v1161_v52 }
 0x169   : > { %v1142_v9 = vpop.f32.mrf.mxu0  ;;  %v1163_v61 = vpop.f32.mrf.mxu1 }
 0x16a   : > { %v1674_v15 = vpack.c.bf16 %v1198_v50, %v1198_v50  ;;  %v1191_v22 = vadd.f32 %v2233_v6, %v1176_v54  ;;  %v1196_v56 = vadd.f32 %v2233_v6, %v1181_v55 }
 0x16b   : > { %v1164_v58 = vpop.f32.mrf.mxu1 }
 0x16c   : > { %1239 = vst.msk [vmem:[%s2244_s25] sm:$0xf] %vm1238_vm10, %v1674_v15  ;;  %v1199_v57 = vmax.f32 %v1191_v22, 0.0  ;;  %v1204_v59 = vmax.f32 %v1196_v56, 0.0  ;;  %v1182_v23 = vmul.f32 %v2228_v0, %v1164_v58 }
 0x16d   : > { %v1166_v60 = vpop.f32.mrf.mxu1 }
 0x16e   : > { %v1675_v28 = vpack.c.bf16 %v1199_v57, %v1199_v57  ;;  %v1680_v47 = vpack.c.bf16 %v1204_v59, %v1204_v59  ;;  %v1197_v53 = vadd.f32 %v2233_v6, %v1182_v23 }
 0x16f   : > { %v1699_v10 = vpop.f32.mrf.mxu1 }
 0x170   : > { %1240 = vst.msk [vmem:[%s2244_s25 + $0x4] sm:$0xf] %vm1238_vm10, %v1675_v28  ;;  %1245 = vst.msk [vmem:[%s2244_s25 + $0x18] sm:$0xf] %vm1238_vm10, %v1680_v47  ;;  %v1205_v7 = vmax.f32 %v1197_v53, 0.0  ;;  %v1369_v12 = vmul.f32 %v1699_v10, %v1660_v63 }
 0x171   : > { %v1329_v17 = vpop.f32.mrf.mxu1 }
 0x172   : > { %v1681_v18 = vpack.c.bf16 %v1205_v7, %v1205_v7  ;;  %v1384_v1 = vadd.f32 %v1661_v2, %v1369_v12  ;;  %v1367_v16 = vmul.f32 %v1660_v63, %v1329_v17 }
 0x173   : > { %v1700_v11 = vpop.f32.mrf.mxu1 }
 0x174   : > { %1246 = vst.msk [vmem:[%s2244_s25 + $0x1c] sm:$0xf] %vm1238_vm10, %v1681_v18  ;;  %v1684_v20 = vpack.c.bf16 %v1384_v1, %v1384_v1  ;;  %v1145_v21 = vpop.f32.mrf.mxu0  ;;  %v1382_v24 = vadd.f32 %v1661_v2, %v1367_v16  ;;  %v1370_v25 = vmul.f32 %v1700_v11, %v1660_v63 }
 0x175   : > { %v1177_v26 = vmul.f32 %v2228_v0, %v1145_v21  ;;  %v1332_v27 = vpop.f32.mrf.mxu1 }
 0x176   : > { %1424 = vst.msk [vmem:[%s2268_s12 + $0x8] sm:$0xf] %vm1238_vm10, %v1684_v20  ;;  %v1682_v31 = vpack.c.bf16 %v1382_v24, %v1382_v24  ;;  %v1147_v32 = vpop.f32.mrf.mxu0  ;;  %v1385_v37 = vadd.f32 %v1661_v2, %v1370_v25  ;;  %v1368_v38 = vmul.f32 %v1660_v63, %v1332_v27 }
 0x177   : > { %v1192_v62 = vadd.f32 %v2233_v6, %v1177_v26  ;;  %v1703_v4 = vpop.f32.mrf.mxu1 }
 0x178   : > { %1422 = vst.msk [vmem:[%s2268_s12] sm:$0xf] %vm1238_vm10, %v1682_v31  ;;  %v1685_v46 = vpack.c.bf16 %v1385_v37, %v1385_v37  ;;  %v1148_v49 = vpop.f32.mrf.mxu0  ;;  %v1383_v39 = vadd.f32 %v1661_v2, %v1368_v38  ;;  %v1373_v41 = vmul.f32 %v1703_v4, %v1660_v63 }
 0x179   : > { %v1200_v42 = vmax.f32 %v1192_v62, 0.0  ;;  %v1178_v43 = vmul.f32 %v2228_v0, %v1148_v49  ;;  %v1345_v35 = vpop.f32.mrf.mxu1 }
 0x17a   : > { %1425 = vst.msk [vmem:[%s2268_s12 + $0xc] sm:$0xf] %vm1238_vm10, %v1685_v46  ;;  %v1683_v13 = vpack.c.bf16 %v1383_v39, %v1383_v39  ;;  %v1150_v51 = vpop.f32.mrf.mxu0  ;;  %v1388_v29 = vadd.f32 %v1661_v2, %v1373_v41  ;;  %v1371_v34 = vmul.f32 %v1660_v63, %v1345_v35 }
 0x17b   : > { %v1676_v14 = vpack.c.bf16 %v1200_v42, %v1200_v42  ;;  %v1193_v33 = vadd.f32 %v2233_v6, %v1178_v43  ;;  %v1704_v40 = vpop.f32.mrf.mxu1 }
 0x17c   : > { %1423 = vst.msk [vmem:[%s2268_s12 + $0x4] sm:$0xf] %vm1238_vm10, %v1683_v13  ;;  %v1688_v36 = vpack.c.bf16 %v1388_v29, %v1388_v29  ;;  %v1386_v19 = vadd.f32 %v1661_v2, %v1371_v34  ;;  %v1374_v3 = vmul.f32 %v1704_v40, %v1660_v63 }
 0x17d   : > { %1241 = vst.msk [vmem:[%s2244_s25 + $0x8] sm:$0xf] %vm1238_vm10, %v1676_v14  ;;  %v1201_v48 = vmax.f32 %v1193_v33, 0.0  ;;  %v1348_v5 = vpop.f32.mrf.mxu1 }
 0x17e   : > { %1428 = vst.msk [vmem:[%s2268_s12 + $0x18] sm:$0xf] %vm1238_vm10, %v1688_v36  ;;  %v1686_v30 = vpack.c.bf16 %v1386_v19, %v1386_v19  ;;  %v1389_v44 = vadd.f32 %v1661_v2, %v1374_v3  ;;  %v1372_v45 = vmul.f32 %v1660_v63, %v1348_v5 }
 0x17f   : > { %v1677_v8 = vpack.c.bf16 %v1201_v48, %v1201_v48 }
 0x180   : > { %1426 = vst.msk [vmem:[%s2268_s12 + $0x10] sm:$0xf] %vm1238_vm10, %v1686_v30  ;;  %v1689_v50 = vpack.c.bf16 %v1389_v44, %v1389_v44  ;;  %v1387_v52 = vadd.f32 %v1661_v2, %v1372_v45 }
 0x181   : > { %1242 = vst.msk [vmem:[%s2244_s25 + $0xc] sm:$0xf] %vm1238_vm10, %v1677_v8 }
 0x182   : > { %1429 = vst.msk [vmem:[%s2268_s12 + $0x1c] sm:$0xf] %vm1238_vm10, %v1689_v50  ;;  %v1687_v54 = vpack.c.bf16 %v1387_v52, %v1387_v52 }
 0x183   : > { %v1153_v55 = vpop.f32.mrf.mxu0 }
 0x184   : > { %v1179_v9 = vmul.f32 %v2228_v0, %v1153_v55  ;;  %1427 = vst.msk [vmem:[%s2268_s12 + $0x14] sm:$0xf] %vm1238_vm10, %v1687_v54 }
 0x185   : > { %v1155_v15 = vpop.f32.mrf.mxu0 }
 0x186   : > { %v1194_v61 = vadd.f32 %v2233_v6, %v1179_v9 }
 0x187   : > { %v1156_v22 = vpop.f32.mrf.mxu0 }
 0x188   : > { %v1202_v56 = vmax.f32 %v1194_v61, 0.0  ;;  %v1180_v57 = vmul.f32 %v2228_v0, %v1156_v22 }
 0x189   : > { %v1158_v58 = vpop.f32.mrf.mxu0 }
 0x18a   : > { %v1678_v59 = vpack.c.bf16 %v1202_v56, %v1202_v56  ;;  %v1195_v23 = vadd.f32 %v2233_v6, %v1180_v57 }
 0x18c   : > { %1243 = vst.msk [vmem:[%s2244_s25 + $0x10] sm:$0xf] %vm1238_vm10, %v1678_v59  ;;  %v1203_v28 = vmax.f32 %v1195_v23, 0.0 }
 0x18e   : > { %v1679_v60 = vpack.c.bf16 %v1203_v28, %v1203_v28 }
 0x190   : > { %1244 = vst.msk [vmem:[%s2244_s25 + $0x14] sm:$0xf] %vm1238_vm10, %v1679_v60 }
 0x191 PF: > { %s19_s27 = sadd.s32 1, %s1784_s27  }
 0x192   : > { %p16_p4 = scmp.ge.s32.totalorder %s19_s27, 4  }
 0x194   :  { %18 = sbr.rel (!%p16_p4) target bundleno = 1 (0x1), region = 95 }

// kernel: residual_block_forward.4
= control target key start
LH: loop header
LB: loop body
LE: loop exit
PB: predicated region body
PF: predicated region fallthrough
CT: control target
= control target key end

     0   :  { %s1826_s18 = smov 0   ;;  %s2409_s0 = inlined_call_operand.vmem [shape: bf16[2,10,10,32], index: 0, kind: input, shape index: {}]   ;;  %s2410_s1 = inlined_call_operand.vmem [shape: bf16[288,32], index: 1, kind: input, shape index: {}]   ;;  %s2411_s2 = inlined_call_operand.vmem [shape: f32[1,32], index: 2, kind: input, shape index: {}]   ;;  %s2412_s3 = inlined_call_operand.vmem [shape: f32[1,32], index: 3, kind: input, shape index: {}]   ;;  %s2413_s4 = inlined_call_operand.vmem [shape: bf16[2,64,32], index: 4, kind: output, shape index: {0}]   ;;  %s2414_s5 = inlined_call_operand.vmem [shape: f32[2,1,32], index: 5, kind: output, shape index: {1}]  }
   0x1 LB: > { %s1510_s19 = sadd.s32 4294967295, %s1791_s18   ;;  %p1514_p0 = scmp.ge.s32.totalorder %s1791_s18, 1  ;;  %s1791_s18 = sphi %s1826_s18, %s16_s18  }
   0x2   : > { %p190_p1 = scmp.lt.s32.totalorder %s1791_s18, 3 }
   0x4   : > { %p191_p2 = pnand %p1514_p0, %p190_p1 }
   0x5   : > { %p221_p3 = scmp.lt.s32.totalorder (!%p191_p2), %s1510_s19, 1  ;;  %s1793_s13 = smov (!%p191_p2), 64  }
   0x6   : > { %194 = sbr.rel (%p191_p2) target bundleno = 434 (0x1b2), region = 36  ;;  %s1794_s20 = smov (!%p191_p2), 96  }
   0x7   : > { %s1795_s21 = smov (!%p191_p2), 32  }
   0xb   : > { %s2429_s19 = smov (!%p221_p3, %s1510_s19), 1  ;;  %vm390_vm0 = vcmask 1042432   ;;  %v1763_v0 = vld [vmem:[%s2410_s1 + $0x78] sm:$0xff]   ;;  %vm391_vm1 = vcmask 1046532   ;;  %v1765_v2 = vld [vmem:[%s2410_s1 + $0x70] sm:$0xff]   ;;  %v1767_v4 = vld [vmem:[%s2410_s1 + $0x68] sm:$0xff]  }
   0xc   : > { %v1764_v1 = vld [vmem:[%s2410_s1 + $0x38] sm:$0xff]   ;;  %s1743_s24 = smul.u32 80, %s2429_s19  ;;  %1669 = vmatprep.subr.bf16.mxu0 %v1763_v0  ;;  %1727 = vmatprep.subr.bf16.mxu1 %v1763_v0  ;;  %v1766_v3 = vld [vmem:[%s2410_s1 + $0x30] sm:$0xff]   ;;  %v1768_v13 = vld [vmem:[%s2410_s1 + $0x28] sm:$0xff]   ;;  %vm251_vm3 = vsmask.f32 3328  ;;  %s233_s27 = scalar_lea.vmem %s2414_s5, %s2429_s19 }
   0xd   : > { %1670 = vmatpush3.bf16.msra.mxu0 %v1764_v1  ;;  %1735 = vmatpush3.bf16.msra.mxu1 %v1764_v1  ;;  %v1769_v19 = vld [vmem:[%s2410_s1 + $0x60] sm:$0xff]   ;;  %vm1878_vm2 = vmor %vm390_vm0, %vm391_vm1  ;;  %v1771_v1 = vld [vmem:[%s2410_s1 + $0x58] sm:$0xff]   ;;  %vm252_vm4 = vsmask.f32 7440  ;;  %vm975_vm6 = vcmask 261120   ;;  %vm988_vm7 = vcmask 523264  }
   0xe   : > { %s1852_s6 = scalar_lea.vmem %s2409_s0, %s1743_s24  ;;  %1671 = vmatprep.subr.bf16.mxu0 %v1765_v2  ;;  %1728 = vmatprep.subr.bf16.mxu1 %v1765_v2  ;;  %v1770_v36 = vld [vmem:[%s2410_s1 + $0x20] sm:$0xff]   ;;  %vm2014_vm5 = vmor %vm251_vm3, %vm252_vm4  ;;  %vm997_vm8 = vcmask 785408   ;;  %vm1390_vm9 = vcmask 257024   ;;  %vm1428_vm10 = vcmask 253952  }
   0xf   : > { %v1564_v5 = vld [vmem:[%s1852_s6 + $0x40] sm:$0xf]  ;;  %v1565_v6 = vld [vmem:[%s1852_s6 + $0x48] sm:$0xf]  ;;  %v1558_v7 = vld [vmem:[%s1852_s6 + $0x10] sm:$0xf] }
  0x10   : > { %v726_v8 = vshrl.u32 %v1565_v6, 16  ;;  %v729_v9 = vshll.u32 %v1565_v6, 16  ;;  %v1617_v10 = vcombine.low %v1564_v5, %v1565_v6  ;;  %v712_v11 = vshrl.u32 %v1564_v5, 16  ;;  %v1559_v12 = vld [vmem:[%s1852_s6 + $0x18] sm:$0xf] }
  0x11   : > { %v715_v14 = vshll.u32 %v1564_v5, 16  ;;  %v642_v15 = vshrl.u32 %v1559_v12, 16  ;;  %v645_v16 = vshll.u32 %v1559_v12, 16  ;;  %v1614_v17 = vcombine.low %v1558_v7, %v1559_v12  ;;  %v1865_v18 = vld [vmem:[%s1852_s6 + $0xc] sm:$0x1]  ;;  %1672 = vmatpush3.bf16.msra.mxu0 %v1766_v3  ;;  %1736 = vmatpush3.bf16.msra.mxu1 %v1766_v3 }
  0x12   : > { %v728_v20 = vrot.slane %v726_v8, 4  ;;  %v731_v21 = vrot.slane %v729_v9, 5  ;;  %941 = vrot.lane.b32.xlu0 %v1617_v10, %s1793_s13  ;;  %v714_v22 = vrot.slane %v712_v11, 4  ;;  %v628_v23 = vshrl.u32 %v1558_v7, 16  ;;  %v1872_v24 = vld [vmem:[%s1852_s6 + $0x14] sm:$0x1]  ;;  %1673 = vmatprep.subr.bf16.mxu0 %v1767_v4 }
  0x13   : > { %v717_v25 = vrot.slane %v715_v14, 5  ;;  %v644_v26 = vrot.slane %v642_v15, 4  ;;  %v647_v27 = vrot.slane %v645_v16, 5  ;;  %935 = vrot.lane.b32.xlu1 %v1614_v17, %s1793_s13  ;;  %v631_v28 = vshll.u32 %v1558_v7, 16  ;;  %v1542_v29 = vld [vmem:[%s1852_s6 + $0x8] sm:$0xe]  ;;  %1729 = vmatprep.subr.bf16.mxu1 %v1767_v4 }
  0x14   : > { %v732_v30 = vor.u32 %v731_v21, %v728_v20  ;;  %v630_v31 = vrot.slane %v628_v23, 4  ;;  %v466_v33 = vshll.u32 %v1872_v24, 16  ;;  %v1543_v34 = vld [vmem:[%s1852_s6 + $0x10] sm:$0xe]  ;;  %v1550_v35 = vrot.slane %v1542_v29, 9  ;;  %v1772_v16 = vld [vmem:[%s2410_s1 + $0x18] sm:$0xff]  }
  0x15   : > { %v718_v37 = vor.u32 %v717_v25, %v714_v22  ;;  %v648_v38 = vor.u32 %v647_v27, %v644_v26  ;;  %v633_v39 = vrot.slane %v631_v28, 5  ;;  %v580_v40 = vrot.slane %v1865_v18, 5  ;;  %v1526_v41 = vld [vmem:[%s1852_s6 + $0x8] sm:$0xf]  ;;  %v1527_v42 = vld [vmem:[%s1852_s6 + $0x10] sm:$0xf]  ;;  %1674 = vmatpush3.bf16.msra.mxu0 %v1768_v13  ;;  %1737 = vmatpush3.bf16.msra.mxu1 %v1768_v13 }
  0x16   : > { %v1890_v43 = vrot.slane %v732_v30, 4  ;;  %v1551_v44 = vrot.slane %v1543_v34, 9  ;;  %v584_v45 = vrot.slane %v1872_v24, 5  ;;  %v452_v46 = vshll.u32 %v1865_v18, 16  ;;  %v1895_v47 = vld [vmem:[%s1852_s6 + $0x3c] sm:$0x1]  ;;  %1675 = vmatprep.subr.bf16.mxu0 %v1769_v19  ;;  %1730 = vmatprep.subr.bf16.mxu1 %v1769_v19 }
  0x17   : > { %v1897_v48 = vrot.slane %v718_v37, 4  ;;  %v1899_v49 = vrot.slane %v648_v38, 4  ;;  %v634_v50 = vor.u32 %v633_v39, %v630_v31  ;;  %v581_v51 = vsel %vm1878_vm2, %v1550_v35, %v580_v40  ;;  %v1904_v52 = vld [vmem:[%s1852_s6 + $0x44] sm:$0x1]  ;;  %v1548_v53 = vld [vmem:[%s1852_s6 + $0x38] sm:$0xe] }
  0x18   : > { %v585_v54 = vsel %vm1878_vm2, %v1551_v44, %v584_v45  ;;  %v457_v55 = vshrl.u32 %v1527_v42, 16  ;;  %v460_v56 = vshll.u32 %v1527_v42, 16  ;;  %v1602_v57 = vcombine.low %v1526_v41, %v1527_v42  ;;  %v1549_v58 = vld [vmem:[%s1852_s6 + $0x40] sm:$0xe]  ;;  %v1911_v59 = vld [vmem:[%s1852_s6 + $0x4] sm:$0x1] }
  0x19   : > { %v1913_v60 = vrot.slane %v634_v50, 4  ;;  %v1610_v61 = vcombine.low %v581_v51, %v585_v54  ;;  %v443_v62 = vshrl.u32 %v1526_v41, 16  ;;  %v446_v63 = vshll.u32 %v1526_v41, 16  ;;  %v1916_v0 = vld [vmem:[%s1852_s6 + $0xc] sm:$0x1]  ;;  %1676 = vmatpush3.bf16.msra.mxu0 %v1770_v36  ;;  %1738 = vmatpush3.bf16.msra.mxu1 %v1770_v36  ;;  %v1773_v29 = vld [vmem:[%s2410_s1 + $0x50] sm:$0xff]  }
  0x1a   : > { %v1921_v2 = vrot.slane %v457_v55, 4  ;;  %v462_v3 = vrot.slane %v460_v56, 5  ;;  %875 = vrot.lane.b32.xlu1 %v1602_v57, %s1794_s20  ;;  %v536_v4 = vshll.u32 %v1895_v47, 16  ;;  %v550_v5 = vshll.u32 %v1904_v52, 16  ;;  %v366_v6 = vld [vmem:[%s1852_s6] sm:$0xe]  ;;  %1677 = vmatprep.subr.bf16.mxu0 %v1771_v1 }
  0x1b   : > { %907 = vrot.lane.b32.xlu0 %v1610_v61, %s1795_s21  ;;  %v1928_v7 = vrot.slane %v443_v62, 4  ;;  %v1930_v8 = vrot.slane %v446_v63, 5  ;;  %v1556_v9 = vrot.slane %v1548_v53, 9  ;;  %v604_v10 = vrot.slane %v1895_v47, 5  ;;  %v367_v11 = vld [vmem:[%s1852_s6 + $0x8] sm:$0xe]  ;;  %1731 = vmatprep.subr.bf16.mxu1 %v1771_v1 }
  0x1c   : > { %v1557_v12 = vrot.slane %v1549_v58, 9  ;;  %v608_v13 = vrot.slane %v1904_v52, 5  ;;  %v1518_v14 = vrot.slane %v366_v6, 9  ;;  %v1936_v15 = vld [vmem:[%s1852_s6 + $0x34] sm:$0x1]  ;;  %v395_v19 = vrot.slane %v1911_v59, 5 }
  0x1d   : > { %v605_v17 = vsel %vm1878_vm2, %v1556_v9, %v604_v10  ;;  %v1519_v20 = vrot.slane %v367_v11, 9  ;;  %v1945_v21 = vld [vmem:[%s1852_s6 + $0x3c] sm:$0x1]  ;;  %v372_v22 = vld [vmem:[%s1852_s6 + $0x30] sm:$0xe]  ;;  %v463_v23 = vor.u32 %v462_v3, %v1921_v2  ;;  %v399_v26 = vrot.slane %v1916_v0, 5  ;;  %1678 = vmatpush3.bf16.msra.mxu0 %v1772_v16  ;;  %1739 = vmatpush3.bf16.msra.mxu1 %v1772_v16 }
  0x1e   : > { %v609_v25 = vsel %vm1878_vm2, %v1557_v12, %v608_v13  ;;  %v373_v27 = vld [vmem:[%s1852_s6 + $0x38] sm:$0xe]  ;;  %v1524_v28 = vrot.slane %v372_v22, 9  ;;  %v449_v30 = vor.u32 %v1930_v8, %v1928_v7  ;;  %v396_v34 = vsel %vm1878_vm2, %v1518_v14, %v395_v19  ;;  %v1962_v36 = vld [vmem:[%s1852_s6] sm:$0xf]  ;;  %1679 = vmatprep.subr.bf16.mxu0 %v1773_v29  ;;  %v1774_v42 = vld [vmem:[%s2410_s1 + $0x10] sm:$0xff]   ;;  %1732 = vmatprep.subr.bf16.mxu1 %v1773_v29 }
  0x1f   : > { %v1613_v31 = vcombine.low %v605_v17, %v609_v25  ;;  %v419_v35 = vrot.slane %v1936_v15, 5  ;;  %v1965_v37 = vld [vmem:[%s1852_s6 + $0x8] sm:$0xf]  ;;  %v400_v38 = vsel %vm1878_vm2, %v1519_v20, %v399_v26  ;;  %v1525_v39 = vrot.slane %v373_v27, 9  ;;  %v1980_v53 = vld [vmem:[%s1852_s6 + $0x14] sm:$0x1] }
  0x20   : > { %v423_v40 = vrot.slane %v1945_v21, 5  ;;  %v255_v41 = vshrl.u32 %v1962_v36, 16  ;;  %v1598_v44 = vcombine.low %v396_v34, %v400_v38  ;;  %v258_v50 = vshll.u32 %v1962_v36, 16  ;;  %v1983_v54 = vld [vmem:[%s1852_s6 + $0x1c] sm:$0x1]  ;;  %v1775_v61 = vld [vmem:[%s2410_s1 + $0x48] sm:$0xff]  }
  0x21   : > { %913 = vrot.lane.b32.xlu0 %v1613_v31, %s1795_s21  ;;  %v420_v45 = vsel %vm1878_vm2, %v1524_v28, %v419_v35  ;;  %v264_v51 = vshll.u32 %v1911_v59, 16  ;;  %v269_v57 = vshrl.u32 %v1965_v37, 16  ;;  %v272_v58 = vshll.u32 %v1965_v37, 16  ;;  %1680 = vmatpush3.bf16.msra.mxu0 %v1774_v42  ;;  %v1997_v2 = vld [vmem:[%s1852_s6 + $0x30] sm:$0xf]  ;;  %v1776_v3 = vld [vmem:[%s2410_s1 + $0x8] sm:$0xff]  }
  0x22   : > { %v424_v55 = vsel %vm1878_vm2, %v1525_v39, %v423_v40  ;;  %v257_v56 = vrot.slane %v255_v41, 4  ;;  %1740 = vmatpush3.bf16.msra.mxu1 %v1774_v42  ;;  %v1992_v59 = vrot.slane %v463_v23, 4  ;;  %847 = vrot.lane.b32.xlu1 %v1598_v44, %s1793_s13  ;;  %v260_v63 = vrot.slane %v258_v50, 5  ;;  %v2005_v10 = vld [vmem:[%s1852_s6 + $0x38] sm:$0xf]  ;;  %v1778_v14 = vld [vmem:[%s2410_s1 + $0x40] sm:$0xff]  }
  0x23   : > { %v1601_v62 = vcombine.low %v420_v45, %v424_v55  ;;  %v278_v1 = vshll.u32 %v1916_v0, 16  ;;  %v271_v6 = vrot.slane %v269_v57, 4  ;;  %v274_v7 = vrot.slane %v272_v58, 5  ;;  %1681 = vmatprep.subr.bf16.mxu0 %v1775_v61  ;;  %1733 = vmatprep.subr.bf16.mxu1 %v1775_v61  ;;  %v1779_v23 = vld [vmem:[%s2410_s1] sm:$0xff]   ;;  %v1532_v40 = vld [vmem:[%s1852_s6 + $0x38] sm:$0xf] }
  0x24   : > { %v637_v8 = vshll.u32 %v1980_v53, 16  ;;  %v651_v9 = vshll.u32 %v1983_v54, 16  ;;  %v2007_v11 = vrot.slane %v449_v30, 4  ;;  %v261_v12 = vor.u32 %v260_v63, %v257_v56  ;;  %v2042_v56 = vld [vmem:[%s1852_s6 + $0x44] sm:$0x1] }
  0x25   : > { %v266_v0 = vrot.slane %v264_v51, 5  ;;  %v280_v13 = vrot.slane %v278_v1, 5  ;;  %v275_v17 = vor.u32 %v274_v7, %v271_v6  ;;  %v339_v22 = vshrl.u32 %v1997_v2, 16  ;;  %1682 = vmatpush3.bf16.msra.mxu0 %v1776_v3  ;;  %v2045_v63 = vld [vmem:[%s1852_s6 + $0x4c] sm:$0x1] }
  0x26   : > { %v639_v19 = vrot.slane %v637_v8, 5  ;;  %v653_v20 = vrot.slane %v651_v9, 5  ;;  %1741 = vmatpush3.bf16.msra.mxu1 %v1776_v3  ;;  %853 = vrot.lane.b32.xlu1 %v1601_v62, %s1793_s13  ;;  %v262_v25 = vrot.slane %v261_v12, 4  ;;  %v342_v26 = vshll.u32 %v1997_v2, 16 }
  0x27   : > { %v348_v27 = vshll.u32 %v1936_v15, 16  ;;  %v353_v28 = vshrl.u32 %v2005_v10, 16  ;;  %1683 = vmatprep.subr.bf16.mxu0 %v1778_v14  ;;  %v276_v29 = vrot.slane %v275_v17, 4  ;;  %v341_v34 = vrot.slane %v339_v22, 4  ;;  %1734 = vmatprep.subr.bf16.mxu1 %v1778_v14  ;;  %v245_v22 = vld [vmem:[%s1852_s6 + $0x14] sm:$0x1] }
  0x28   : > { %v640_v30 = vsel %vm2014_vm5, %v1913_v60, %v639_v19  ;;  %v654_v31 = vsel %vm2014_vm5, %v1899_v49, %v653_v20  ;;  %v267_v35 = vsel %vm2014_vm5, %v262_v25, %v266_v0  ;;  %v344_v15 = vrot.slane %v342_v26, 5  ;;  %v1533_v49 = vld [vmem:[%s1852_s6 + $0x40] sm:$0xf]  ;;  %v2050_v0 = vld [vmem:[%s1852_s6 + $0x10] sm:$0xf] }
  0x29   : > { %v1618_v38 = vcombine.low %v640_v30, %v654_v31  ;;  %v350_v39 = vrot.slane %v348_v27, 5  ;;  %v281_v41 = vsel %vm2014_vm5, %v276_v29, %v280_v13  ;;  %v355_v42 = vrot.slane %v353_v28, 4  ;;  %1684 = vmatpush3.bf16.msra.mxu0 %v1779_v23  ;;  %v2055_v13 = vld [vmem:[%s2410_s1 + $0x88] sm:$0xff]   ;;  %v2067_v30 = vld [vmem:[%s1852_s6 + $0x18] sm:$0xf] }
  0x2a   : > { %v356_v60 = vshll.u32 %v2005_v10, 16  ;;  %v362_v44 = vshll.u32 %v1945_v21, 16  ;;  %1742 = vmatpush3.bf16.msra.mxu1 %v1779_v23  ;;  %v1594_v45 = vcombine.low %v267_v35, %v281_v41  ;;  %v345_v50 = vor.u32 %v344_v15, %v341_v34  ;;  %v2079_v41 = vld [vmem:[%s1852_s6 + $0x1c] sm:$0x1]  ;;  %v1562_v29 = vld [vmem:[%s1852_s6 + $0x30] sm:$0xf] }
  0x2b   : > { %955 = vrot.lane.b32.xlu1 %v1618_v38, %s1794_s20  ;;  %v527_v51 = vshrl.u32 %v1532_v40, 16  ;;  %v530_v55 = vshll.u32 %v1532_v40, 16  ;;  %v541_v61 = vshrl.u32 %v1533_v49, 16  ;;  %v544_v62 = vshll.u32 %v1533_v49, 16  ;;  %1715 = vmatprep.subr.bf16.mxu1 %v2055_v13 }
  0x2c   : > { %v358_v57 = vrot.slane %v356_v60, 5  ;;  %v364_v58 = vrot.slane %v362_v44, 5  ;;  %827 = vrot.lane.b32.xlu0 %v1594_v45, %s1795_s21  ;;  %v346_v21 = vrot.slane %v345_v50, 4  ;;  %v1605_v6 = vcombine.low %v1532_v40, %v1533_v49  ;;  %v2085_v45 = vld [vmem:[%s1852_s6 + $0x24] sm:$0x1] }
  0x2d   : > { %v529_v1 = vrot.slane %v527_v51, 4  ;;  %v532_v3 = vrot.slane %v530_v55, 5  ;;  %v543_v8 = vrot.slane %v541_v61, 4  ;;  %v546_v9 = vrot.slane %v544_v62, 5  ;;  %v1544_v50 = vld [vmem:[%s1852_s6 + $0x18] sm:$0xe] }
  0x2e   : > { %v359_v7 = vor.u32 %v358_v57, %v355_v42  ;;  %v721_v12 = vshll.u32 %v2042_v56, 16  ;;  %v351_v19 = vsel %vm2014_vm5, %v346_v21, %v350_v39  ;;  %v735_v20 = vshll.u32 %v2045_v63, 16  ;;  %v246_v39 = vld [vmem:[%s1852_s6 + $0x1c] sm:$0x1] }
  0x2f   : > { %881 = vrot.lane.b32.xlu1 %v1605_v6, %s1794_s20  ;;  %v533_v25 = vor.u32 %v532_v3, %v529_v1  ;;  %v547_v26 = vor.u32 %v546_v9, %v543_v8  ;;  %v283_v31 = vshrl.u32 %v2050_v0, 16  ;;  %v286_v34 = vshll.u32 %v2050_v0, 16  ;;  %v368_v1 = vld [vmem:[%s1852_s6 + $0x10] sm:$0xe]  ;;  %v369_v9 = vld [vmem:[%s1852_s6 + $0x18] sm:$0xe] }
  0x30   : > { %v360_v23 = vrot.slane %v359_v7, 4  ;;  %v723_v27 = vrot.slane %v721_v12, 5  ;;  %v737_v28 = vrot.slane %v735_v20, 5  ;;  %v292_v40 = vshll.u32 %v245_v22, 16 }
  0x31   : > { %v285_v44 = vrot.slane %v283_v31, 4  ;;  %v288_v49 = vrot.slane %v286_v34, 5  ;;  %v2088_v51 = vrot.slane %v533_v25, 4  ;;  %v297_v55 = vshrl.u32 %v2067_v30, 16  ;;  %v1560_v25 = vld [vmem:[%s1852_s6 + $0x20] sm:$0xf] }
  0x32   : > { %v365_v35 = vsel %vm2014_vm5, %v360_v23, %v364_v58  ;;  %v724_v38 = vsel %vm2014_vm5, %v1897_v48, %v723_v27  ;;  %v738_v60 = vsel %vm2014_vm5, %v1890_v43, %v737_v28  ;;  %v2090_v48 = vrot.slane %v547_v26, 4  ;;  %v1545_v58 = vld [vmem:[%s1852_s6 + $0x20] sm:$0xe]  ;;  %v1561_v34 = vld [vmem:[%s1852_s6 + $0x28] sm:$0xf] }
  0x33   : > { %v1597_v42 = vcombine.low %v351_v19, %v365_v35  ;;  %v300_v57 = vshll.u32 %v2067_v30, 16  ;;  %v1621_v61 = vcombine.low %v724_v38, %v738_v60  ;;  %v289_v43 = vor.u32 %v288_v49, %v285_v44 }
  0x34   : > { %v294_v62 = vrot.slane %v292_v40, 5  ;;  %v306_v21 = vshll.u32 %v246_v39, 16  ;;  %v299_v3 = vrot.slane %v297_v55, 4  ;;  %v1552_v7 = vrot.slane %v1544_v50, 9 }
  0x35   : > { %833 = vrot.lane.b32.xlu0 %v1597_v42, %s1795_s21  ;;  %v302_v6 = vrot.slane %v300_v57, 5  ;;  %v588_v8 = vrot.slane %v2079_v41, 5  ;;  %v290_v12 = vrot.slane %v289_v43, 4  ;;  %v1553_v20 = vrot.slane %v1545_v58, 9  ;;  %v2116_v43 = vld [vmem:[%s1852_s6 + $0x20] sm:$0xf] }
  0x36   : > { %v308_v19 = vrot.slane %v306_v21, 5  ;;  %v592_v23 = vrot.slane %v2085_v45, 5  ;;  %v1520_v28 = vrot.slane %v368_v1, 9  ;;  %v403_v31 = vrot.slane %v245_v22, 5 }
  0x37   : > { %v303_v26 = vor.u32 %v302_v6, %v299_v3  ;;  %v589_v27 = vsel %vm1878_vm2, %v1552_v7, %v588_v8  ;;  %v1521_v40 = vrot.slane %v369_v9, 9  ;;  %v407_v42 = vrot.slane %v246_v39, 5  ;;  %v2123_v3 = vld [vmem:[%s1852_s6 + $0x24] sm:$0x1]  ;;  %v2126_v6 = vld [vmem:[%s1852_s6 + $0x2c] sm:$0x1] }
  0x38   : > { %v593_v38 = vsel %vm1878_vm2, %v1553_v20, %v592_v23  ;;  %v295_v60 = vsel %vm2014_vm5, %v290_v12, %v294_v62  ;;  %v656_v50 = vshrl.u32 %v1560_v25, 16  ;;  %v404_v22 = vsel %vm1878_vm2, %v1520_v28, %v403_v31 }
  0x39   : > { %961 = vrot.lane.b32.xlu0 %v1621_v61, %s1794_s20  ;;  %v304_v44 = vrot.slane %v303_v26, 4  ;;  %v1611_v49 = vcombine.low %v589_v27, %v593_v38  ;;  %v659_v55 = vshll.u32 %v1560_v25, 16  ;;  %v670_v57 = vshrl.u32 %v1561_v34, 16  ;;  %v2113_v61 = vld [vmem:[%s1852_s6 + $0x18] sm:$0xf] }
  0x3a   : > { %v673_v58 = vshll.u32 %v1561_v34, 16  ;;  %v408_v62 = vsel %vm1878_vm2, %v1521_v40, %v407_v42  ;;  %v658_v21 = vrot.slane %v656_v50, 4  ;;  %v1615_v1 = vcombine.low %v1560_v25, %v1561_v34  ;;  %v2134_v26 = vld [vmem:[%s1852_s6 + $0x20] sm:$0xf]  ;;  %v2139_v38 = vld [vmem:[%s1852_s6 + $0x28] sm:$0xf] }
  0x3b   : > { %v309_v39 = vsel %vm2014_vm5, %v304_v44, %v308_v19  ;;  %v661_v8 = vrot.slane %v659_v55, 5  ;;  %v672_v9 = vrot.slane %v670_v57, 4  ;;  %v471_v20 = vshrl.u32 %v2113_v61, 16  ;;  %v2142_v40 = vld [vmem:[%s1852_s6 + $0x24] sm:$0x1] }
  0x3c   : > { %v1595_v7 = vcombine.low %v295_v60, %v309_v39  ;;  %v675_v12 = vrot.slane %v673_v58, 5  ;;  %v474_v19 = vshll.u32 %v2113_v61, 16  ;;  %v485_v23 = vshrl.u32 %v2116_v43, 16  ;;  %v248_v58 = vld [vmem:[%s1852_s6 + $0x2c] sm:$0x1] }
  0x3d   : > { %909 = vrot.lane.b32.xlu0 %v1611_v49, %s1795_s21  ;;  %v488_v25 = vshll.u32 %v2116_v43, 16  ;;  %v1599_v27 = vcombine.low %v404_v22, %v408_v62  ;;  %v662_v28 = vor.u32 %v661_v8, %v658_v21  ;;  %v665_v31 = vshll.u32 %v2123_v3, 16 }
  0x3e   : > { %829 = vrot.lane.b32.xlu1 %v1595_v7, %s1795_s21  ;;  %v676_v34 = vor.u32 %v675_v12, %v672_v9  ;;  %v473_v42 = vrot.slane %v471_v20, 4  ;;  %v476_v60 = vrot.slane %v474_v19, 5  ;;  %v487_v44 = vrot.slane %v485_v23, 4  ;;  %v2156_v20 = vld [vmem:[%s1852_s6 + $0x2c] sm:$0x1] }
  0x3f   : > { %v490_v49 = vrot.slane %v488_v25, 5  ;;  %v663_v50 = vrot.slane %v662_v28, 4  ;;  %v667_v55 = vrot.slane %v665_v31, 5  ;;  %v679_v57 = vshll.u32 %v2126_v6, 16  ;;  %v1546_v19 = vld [vmem:[%s1852_s6 + $0x28] sm:$0xe] }
  0x40   : > { %v677_v22 = vrot.slane %v676_v34, 4  ;;  %v477_v62 = vor.u32 %v476_v60, %v473_v42  ;;  %v1603_v7 = vcombine.low %v2113_v61, %v2116_v43  ;;  %v311_v9 = vshrl.u32 %v2134_v26, 16  ;;  %v1547_v23 = vld [vmem:[%s1852_s6 + $0x30] sm:$0xe]  ;;  %v2165_v28 = vld [vmem:[%s1852_s6 + $0x34] sm:$0x1] }
  0x41   : > { %937 = vrot.lane.b32.xlu0 %v1615_v1, %s1793_s13  ;;  %v491_v21 = vor.u32 %v490_v49, %v487_v44  ;;  %v668_v1 = vsel %vm2014_vm5, %v663_v50, %v667_v55  ;;  %v681_v8 = vrot.slane %v679_v57, 5  ;;  %v314_v12 = vshll.u32 %v2134_v26, 16  ;;  %v370_v31 = vld [vmem:[%s1852_s6 + $0x20] sm:$0xe]  ;;  %v371_v49 = vld [vmem:[%s1852_s6 + $0x28] sm:$0xe] }
  0x42   : > { %849 = vrot.lane.b32.xlu1 %v1599_v27, %s1793_s13  ;;  %v320_v43 = vshll.u32 %v2142_v40, 16  ;;  %v325_v27 = vshrl.u32 %v2139_v38, 16  ;;  %v313_v42 = vrot.slane %v311_v9, 4  ;;  %v328_v44 = vshll.u32 %v2139_v38, 16 }
  0x43   : > { %v682_v34 = vsel %vm2014_vm5, %v677_v22, %v681_v8  ;;  %v316_v60 = vrot.slane %v314_v12, 5  ;;  %v2172_v50 = vrot.slane %v477_v62, 4  ;;  %v334_v15 = vshll.u32 %v248_v58, 16  ;;  %v1563_v62 = vld [vmem:[%s1852_s6 + $0x38] sm:$0xf] }
  0x44   : > { %v1619_v55 = vcombine.low %v668_v1, %v682_v34  ;;  %v327_v57 = vrot.slane %v325_v27, 4  ;;  %v2175_v61 = vrot.slane %v491_v21, 4  ;;  %v322_v17 = vrot.slane %v320_v43, 5 }
  0x45   : > { %v317_v25 = vor.u32 %v316_v60, %v313_v42  ;;  %v330_v14 = vrot.slane %v328_v44, 5  ;;  %v336_v22 = vrot.slane %v334_v15, 5  ;;  %v1554_v8 = vrot.slane %v1546_v19, 9 }
  0x46   : > { %877 = vrot.lane.b32.xlu1 %v1603_v7, %s1794_s20  ;;  %957 = vrot.lane.b32.xlu0 %v1619_v55, %s1794_s20  ;;  %v596_v9 = vrot.slane %v2156_v20, 5  ;;  %v1555_v12 = vrot.slane %v1547_v23, 9  ;;  %v600_v21 = vrot.slane %v2165_v28, 5  ;;  %v1522_v27 = vrot.slane %v370_v31, 9  ;;  %v1530_v55 = vld [vmem:[%s1852_s6 + $0x28] sm:$0xf] }
  0x47   : > { %v318_v39 = vrot.slane %v317_v25, 4  ;;  %v331_v1 = vor.u32 %v330_v14, %v327_v57  ;;  %v411_v43 = vrot.slane %v2142_v40, 5  ;;  %v1523_v34 = vrot.slane %v371_v49, 9  ;;  %v1531_v40 = vld [vmem:[%s1852_s6 + $0x30] sm:$0xf] }
  0x48   : > { %v597_v7 = vsel %vm1878_vm2, %v1554_v8, %v596_v9  ;;  %v415_v15 = vrot.slane %v248_v58, 5  ;;  %v601_v14 = vsel %vm1878_vm2, %v1555_v12, %v600_v21  ;;  %v684_v25 = vshrl.u32 %v1562_v29, 16  ;;  %v2195_v49 = vld [vmem:[%s1852_s6 + $0x34] sm:$0x1]  ;;  %v2202_v8 = vld [vmem:[%s1852_s6 + $0x3c] sm:$0x1] }
  0x49   : > { %v323_v19 = vsel %vm2014_vm5, %v318_v39, %v322_v17  ;;  %v332_v23 = vrot.slane %v331_v1, 4  ;;  %v1612_v60 = vcombine.low %v597_v7, %v601_v14  ;;  %v412_v31 = vsel %vm1878_vm2, %v1522_v27, %v411_v43 }
  0x4a   : > { %v687_v44 = vshll.u32 %v1562_v29, 16  ;;  %v416_v17 = vsel %vm1878_vm2, %v1523_v34, %v415_v15  ;;  %v686_v39 = vrot.slane %v684_v25, 4  ;;  %v698_v57 = vshrl.u32 %v1563_v62, 16 }
  0x4b   : > { %v337_v58 = vsel %vm2014_vm5, %v332_v23, %v336_v22  ;;  %911 = vrot.lane.b32.xlu0 %v1612_v60, %s1795_s21  ;;  %v701_v1 = vshll.u32 %v1563_v62, 16  ;;  %v1616_v21 = vcombine.low %v1562_v29, %v1563_v62  ;;  %v499_v7 = vshrl.u32 %v1530_v55, 16 }
  0x4c   : > { %v1596_v9 = vcombine.low %v323_v19, %v337_v58  ;;  %v689_v12 = vrot.slane %v687_v44, 5  ;;  %v700_v27 = vrot.slane %v698_v57, 4  ;;  %v502_v43 = vshll.u32 %v1530_v55, 16 }
  0x4d   : > { %v513_v14 = vshrl.u32 %v1531_v40, 16  ;;  %v1600_v22 = vcombine.low %v412_v31, %v416_v17  ;;  %v703_v23 = vrot.slane %v701_v1, 5  ;;  %v516_v42 = vshll.u32 %v1531_v40, 16 }
  0x4e   : > { %831 = vrot.lane.b32.xlu1 %v1596_v9, %s1795_s21  ;;  %v690_v34 = vor.u32 %v689_v12, %v686_v39  ;;  %v501_v15 = vrot.slane %v499_v7, 4  ;;  %v504_v25 = vrot.slane %v502_v43, 5  ;;  %v693_v19 = vshll.u32 %v2195_v49, 16  ;;  %s1660_s21 = sshll.u32 %s2429_s19, 5 }
  0x4f   : > { %v515_v35 = vrot.slane %v513_v14, 4  ;;  %939 = vrot.lane.b32.xlu0 %v1616_v21, %s1793_s13  ;;  %v518_v60 = vrot.slane %v516_v42, 5  ;;  %v704_v29 = vor.u32 %v703_v23, %v700_v27  ;;  %v707_v62 = vshll.u32 %v2202_v8, 16  ;;  %v1576_v27 = vld [vmem:[%s1852_s6 + $0x20] sm:$0xe]  ;;  %s2362_s24 = scalar_lea.vmem %s2413_s4, %s1660_s21 }
  0x50   : > { %v691_v44 = vrot.slane %v690_v34, 4  ;;  %v522_v58 = vshll.u32 %v2165_v28, 16  ;;  %v505_v57 = vor.u32 %v504_v25, %v501_v15  ;;  %v1604_v9 = vcombine.low %v1530_v55, %v1531_v40 }
  0x51   : > { %v695_v31 = vrot.slane %v693_v19, 5  ;;  %v705_v17 = vrot.slane %v704_v29, 4  ;;  %v709_v39 = vrot.slane %v707_v62, 5  ;;  %v781_v12 = vrot.slane %v2195_v49, 5 }
  0x52   : > { %851 = vrot.lane.b32.xlu1 %v1600_v22, %s1793_s13  ;;  %v468_v42 = vrot.slane %v466_v33, 5  ;;  %v519_v1 = vor.u32 %v518_v60, %v515_v35  ;;  %v454_v28 = vrot.slane %v452_v46, 5  ;;  %v538_v55 = vrot.slane %v536_v4, 5  ;;  %v1574_v4 = vld [vmem:[%s1852_s6 + $0x10] sm:$0xe] }
  0x53   : > { %v696_v21 = vsel %vm2014_vm5, %v691_v44, %v695_v31  ;;  %v710_v40 = vsel %vm2014_vm5, %v705_v17, %v709_v39  ;;  %v785_v49 = vrot.slane %v2202_v8, 5  ;;  %v552_v33 = vrot.slane %v550_v5, 5  ;;  %v1575_v8 = vld [vmem:[%s1852_s6 + $0x18] sm:$0xe] }
  0x54   : > { %v469_v24 = vsel %vm2014_vm5, %v1992_v59, %v468_v42  ;;  %v1620_v35 = vcombine.low %v696_v21, %v710_v40  ;;  %v455_v18 = vsel %vm2014_vm5, %v2007_v11, %v454_v28  ;;  %v539_v46 = vsel %vm2014_vm5, %v2088_v51, %v538_v55  ;;  %v1577_v11 = vld [vmem:[%s1852_s6 + $0x28] sm:$0xe] }
  0x55   : > { %v1590_v47 = vcombine.low %v1962_v36, %v1965_v37  ;;  %v506_v7 = vrot.slane %v505_v57, 4  ;;  %v1606_v52 = vcombine.low %v455_v18, %v469_v24  ;;  %v553_v5 = vsel %vm2014_vm5, %v2090_v48, %v552_v33  ;;  %v1578_v57 = vld [vmem:[%s1852_s6 + $0x30] sm:$0xe]  ;;  %v1581_v21 = vld [vmem:[%s1852_s6 + $0x48] sm:$0xe] }
  0x56   : > { %879 = vrot.lane.b32.xlu1 %v1604_v9, %s1794_s20  ;;  %v1593_v59 = vcombine.low %v1997_v2, %v2005_v10  ;;  %v520_v51 = vrot.slane %v519_v1, 4  ;;  %959 = vrot.lane.b32.xlu0 %v1620_v35, %s1794_s20  ;;  %v1609_v43 = vcombine.low %v539_v46, %v553_v5  ;;  %v1591_v14 = vcombine.low %v2050_v0, %v2067_v30  ;;  %v1579_v9 = vld [vmem:[%s1852_s6 + $0x38] sm:$0xe]  ;;  %v1580_v1 = vld [vmem:[%s1852_s6 + $0x40] sm:$0xe] }
  0x57   : > { %v2419_v22 = vshll.u32 %v2079_v41, 16  ;;  %v2420_v34 = vshll.u32 %v2085_v45, 16  ;;  %v1582_v15 = vrot.slane %v1574_v4, 9  ;;  %v1583_v25 = vrot.slane %v1575_v8, 9 }
  0x58   : > { %v1584_v19 = vrot.slane %v1576_v27, 9  ;;  %v1585_v44 = vrot.slane %v1577_v11, 9  ;;  %v1592_v29 = vcombine.low %v2134_v26, %v2139_v38  ;;  %v2421_v62 = vshll.u32 %v2156_v20, 16 }
  0x59   : > { %v482_v23 = vrot.slane %v2419_v22, 5  ;;  %v496_v48 = vrot.slane %v2420_v34, 5  ;;  %v2422_v31 = vrot.slane %v1980_v53, 5  ;;  %v2424_v42 = vrot.slane %v2123_v3, 5 }
  0x5a   : > { %v510_v41 = vrot.slane %v2421_v62, 5  ;;  %v524_v24 = vrot.slane %v522_v58, 5  ;;  %v1586_v33 = vrot.slane %v1578_v57, 9  ;;  %v1587_v35 = vrot.slane %v1579_v9, 9 }
  0x5b   : > { %v483_v60 = vsel %vm2014_vm5, %v2172_v50, %v482_v23  ;;  %v497_v45 = vsel %vm2014_vm5, %v2175_v61, %v496_v48  ;;  %v766_v17 = vsel %vm1878_vm2, %v1582_v15, %v2422_v31  ;;  %v2423_v50 = vrot.slane %v1983_v54, 5  ;;  %v1783_v31 = vld [vmem:[%s2410_s1 + $0x80] sm:$0xff]  }
  0x5c   : > { %v774_v20 = vsel %vm1878_vm2, %v1584_v19, %v2424_v42  ;;  %v1607_v28 = vcombine.low %v483_v60, %v497_v45  ;;  %v2425_v61 = vrot.slane %v2126_v6, 5  ;;  %v511_v54 = vsel %vm2014_vm5, %v506_v7, %v510_v41 }
  0x5d   : > { %v770_v39 = vsel %vm1878_vm2, %v1583_v25, %v2423_v50  ;;  %v1588_v3 = vrot.slane %v1580_v1, 9  ;;  %v1589_v18 = vrot.slane %v1581_v21, 9  ;;  %v525_v46 = vsel %vm2014_vm5, %v520_v51, %v524_v24 }
  0x5e   : > { %v1622_v55 = vcombine.low %v766_v17, %v770_v39  ;;  %v778_v53 = vsel %vm1878_vm2, %v1585_v44, %v2425_v61  ;;  %v782_v4 = vsel %vm1878_vm2, %v1586_v33, %v781_v12  ;;  %v786_v6 = vsel %vm1878_vm2, %v1587_v35, %v785_v49 }
  0x5f   : > { %v1623_v40 = vcombine.low %v774_v20, %v778_v53  ;;  %v2291_v8 = vcombine.low %v511_v54, %v525_v46  ;;  %v1624_v27 = vcombine.low %v782_v4, %v786_v6  ;;  %v2426_v7 = vrot.slane %v2042_v56, 5 }
  0x60   : > { %v2427_v5 = vrot.slane %v2045_v63, 5 }
  0x61   : > { %v790_v58 = vsel %vm1878_vm2, %v1588_v3, %v2426_v7 }
  0x62   : > { %v794_v16 = vsel %vm1878_vm2, %v1589_v18, %v2427_v5 }
  0x63   : > { %v1625_v11 = vcombine.low %v790_v58, %v794_v16  ;;  %v2349_v58 = vld [vmem:[%s2411_s2] ss:$0 sm:$0xff] }
  0x64   : > { %v2354_v16 = vld [vmem:[%s2412_s3] ss:$0 sm:$0xff] }
  0x84   : > { %v942_v22 = vpop.permute.xlu0 %941 }
  0x85   : > { %v936_v51 = vpop.permute.xlu1 %935 }
  0x8c   : > { %v876_v12 = vpop.permute.xlu1 %875 }
  0x8d   : > { %v908_v23 = vpop.permute.xlu0 %907 }
  0x8e   : > { %v1012_v15 = vsel %vm975_vm6, %v1606_v52, %v908_v23 }
  0x8f   : > { %v1023_v25 = vsel %vm988_vm7, %v1012_v15, %v936_v51 }
  0x93   : > { %v914_v49 = vpop.permute.xlu0 %913 }
  0x94   : > { %v848_v34 = vpop.permute.xlu1 %847  ;;  %v1021_v62 = vsel %vm975_vm6, %v1609_v43, %v914_v49 }
  0x95   : > { %v1029_v36 = vsel %vm988_vm7, %v1021_v62, %v942_v22 }
  0x98   : > { %v854_v48 = vpop.permute.xlu1 %853 }
  0x9d   : > { %v956_v56 = vpop.permute.xlu1 %955 }
  0x9e   : > { %v1031_v63 = vsel %vm997_vm8, %v1023_v25, %v956_v56  ;;  %v828_v32 = vpop.permute.xlu0 %827 }
  0x9f   : > { %1230 = vmatprep.mubr.bf16.mxu0 %v1031_v63  ;;  %v978_v19 = vsel %vm975_vm6, %v1590_v47, %v828_v32 }
  0xa0   : > { %v990_v60 = vsel %vm988_vm7, %v978_v19, %v848_v34 }
  0xa1   : > { %v999_v44 = vsel %vm997_vm8, %v990_v60, %v876_v12  ;;  %v882_v57 = vpop.permute.xlu1 %881 }
  0xa2   : > { %1231 = vmatmul.mubr.bf16.vlgmr.msra.gmra.mxu0 %v999_v44 }
  0xa7   : > { %v834_v52 = vpop.permute.xlu0 %833 }
  0xa8   : > { %v987_v41 = vsel %vm975_vm6, %v1593_v59, %v834_v52 }
  0xa9   : > { %v996_v9 = vsel %vm988_vm7, %v987_v41, %v854_v48 }
  0xaa   : > { %v1008_v37 = vsel %vm997_vm8, %v996_v9, %v882_v57 }
  0xab   : > { %v962_v45 = vpop.permute.xlu0 %961 }
  0xac   : > { %v1040_v47 = vsel %vm997_vm8, %v1029_v36, %v962_v45 }
  0xad   : > { %1254 = vmatprep.mubr.bf16.mxu1 %v1040_v47 }
  0xae   : > { %1255 = vmatmul.mubr.bf16.vlgmr.msra.gmra.mxu1 %v1008_v37 }
  0xaf   : > { %1716 = vmatpush3.bf16.msra.mxu1 %v2055_v13  ;;  %v910_v2 = vpop.permute.xlu0 %909  ;;  %1719 = vmatprep.mubr.msk.bf16.mxu1 %vm975_vm6, %v1622_v55 }
  0xb0   : > { %1717 = vmatprep.subr.bf16.mxu1 %v1783_v31  ;;  %v830_v10 = vpop.permute.xlu1 %829  ;;  %v1015_v50 = vsel %vm975_vm6, %v1607_v28, %v910_v2 }
  0xb1   : > { %v981_v17 = vsel %vm975_vm6, %v1591_v14, %v830_v10 }
  0xb3   : > { %1718 = vmatpush3.bf16.msra.mxu1 %v1783_v31  ;;  %v938_v59 = vpop.permute.xlu0 %937 }
  0xb4   : > { %v850_v43 = vpop.permute.xlu1 %849  ;;  %v1025_v42 = vsel %vm988_vm7, %v1015_v50, %v938_v59 }
  0xb5   : > { %v992_v13 = vsel %vm988_vm7, %v981_v17, %v850_v43 }
  0xb6   : > { %1720 = vmatmul.mubr.msk.bf16.vlgmr.msra.gmra.mxu1 %vm975_vm6, %v1623_v40 }
  0xb7   : > { %1723 = vmatprep.mubr.msk.bf16.mxu1 %vm975_vm6, %v1624_v27 }
  0xb8   : > { %v878_v39 = vpop.permute.xlu1 %877  ;;  %v958_v20 = vpop.permute.xlu0 %957 }
  0xb9   : > { %v1002_v1 = vsel %vm997_vm8, %v992_v13, %v878_v39  ;;  %v1034_v21 = vsel %vm997_vm8, %v1025_v42, %v958_v20 }
  0xba   : > { %1238 = vmatprep.mubr.bf16.mxu0 %v1034_v21 }
  0xbb   : > { %1239 = vmatmul.mubr.bf16.gmra.mxu0 %v1002_v1 }
  0xbd   : > { %v912_v55 = vpop.permute.xlu0 %911 }
  0xbe   : > { %1724 = vmatmul.mubr.msk.bf16.gmra.mxu1 %vm975_vm6, %v1625_v11  ;;  %v1018_v61 = vsel %vm975_vm6, %v2291_v8, %v912_v55 }
  0xc0   : > { %v832_v0 = vpop.permute.xlu1 %831 }
  0xc1   : > { %v940_v30 = vpop.permute.xlu0 %939  ;;  %v984_v28 = vsel %vm975_vm6, %v1592_v29, %v832_v0 }
  0xc2   : > { %v1027_v40 = vsel %vm988_vm7, %v1018_v61, %v940_v30 }
  0xc4   : > { %v852_v14 = vpop.permute.xlu1 %851 }
  0xc5   : > { %v994_v53 = vsel %vm988_vm7, %v984_v28, %v852_v14 }
  0xc8   : > { %v880_v54 = vpop.permute.xlu1 %879  ;;  %v960_v24 = vpop.permute.xlu0 %959 }
  0xc9   : > { %v1005_v33 = vsel %vm997_vm8, %v994_v53, %v880_v54  ;;  %v1037_v35 = vsel %vm997_vm8, %v1027_v40, %v960_v24 }
  0xca   : > { %1246 = vmatprep.mubr.bf16.mxu0 %v1037_v35 }
  0xcb   : > { %1247 = vmatmul.mubr.bf16.gmra.mxu0 %v1005_v33 }
 0x162   : > { %v1685_v3 = vpop.f32.mrf.mxu0 }
 0x164   : > { %v1686_v38 = vpop.f32.mrf.mxu0 }
 0x165   : > { %v1687_v8 = vadd.f32 %v1686_v38, %v1685_v3 }
 0x166   : > { %v1688_v46 = vpop.f32.mrf.mxu0 }
 0x168   : > { %v1689_v27 = vpop.f32.mrf.mxu0 }
 0x169   : > { %v1690_v51 = vadd.f32 %v1689_v27, %v1688_v46 }
 0x16e   : > { %v1703_v26 = vpop.f32.mrf.mxu1 }
 0x170   : > { %v1704_v29 = vpop.f32.mrf.mxu1 }
 0x171   : > { %v1705_v23 = vadd.f32 %v1704_v29, %v1703_v26 }
 0x172   : > { %v1706_v18 = vpop.f32.mrf.mxu1 }
 0x174   : > { %v1707_v4 = vpop.f32.mrf.mxu1 }
 0x175   : > { %v1708_v44 = vadd.f32 %v1707_v4, %v1706_v18 }
 0x176   : > { %v1721_v6 = vpop.f32.mrf.mxu1 }
 0x178   : > { %v1297_v7 = vpop.f32.mrf.mxu1 }
 0x179   : > { %v1298_v5 = vadd.f32 %v1687_v8, %v1297_v7 }
 0x17a   : > { %v1722_v11 = vpop.f32.mrf.mxu1 }
 0x17b   : > { %v1335_v22 = vmul.f32 %v2349_v58, %v1298_v5  ;;  %v1691_v49 = vpop.f32.mrf.mxu0 }
 0x17c   : > { %v1300_v12 = vpop.f32.mrf.mxu1 }
 0x17d   : > { %v1350_v34 = vadd.f32 %v2354_v16, %v1335_v22  ;;  %v1301_v48 = vadd.f32 %v1690_v51, %v1300_v12  ;;  %v1692_v25 = vpop.f32.mrf.mxu0 }
 0x17e   : > { %v1725_v15 = vpop.f32.mrf.mxu1  ;;  %v1693_v19 = vadd.f32 %v1692_v25, %v1691_v49 }
 0x17f   : > { %v1661_v56 = vpack.c.bf16 %v1350_v34, %v1350_v34  ;;  %v1336_v63 = vmul.f32 %v2349_v58, %v1301_v48  ;;  %v1322_v32 = vadd.f32 %v1725_v15, %v1705_v23  ;;  %v1694_v62 = vpop.f32.mrf.mxu0 }
 0x180   : > { %v1313_v60 = vpop.f32.mrf.mxu1  ;;  %v1306_v57 = vadd.f32 %v1721_v6, %v1693_v19 }
 0x181   : > { %1391 = vst.msk [vmem:[%s2362_s24] sm:$0xf] %vm1390_vm9, %v1661_v56  ;;  %v1351_v52 = vadd.f32 %v2354_v16, %v1336_v63  ;;  %v1341_v41 = vmul.f32 %v2349_v58, %v1322_v32  ;;  %v1695_v37 = vpop.f32.mrf.mxu0 }
 0x182   : > { %v1726_v9 = vpop.f32.mrf.mxu1  ;;  %v1337_v31 = vmul.f32 %v2349_v58, %v1306_v57  ;;  %v1696_v2 = vadd.f32 %v1695_v37, %v1694_v62 }
 0x183   : > { %v1662_v45 = vpack.c.bf16 %v1351_v52, %v1351_v52  ;;  %v1356_v36 = vadd.f32 %v2354_v16, %v1341_v41  ;;  %v1325_v47 = vadd.f32 %v1726_v9, %v1708_v44  ;;  %v1358_v3 = vpack.c.bf16 %v1351_v52, %v1350_v34 }
 0x184   : > { %v1352_v43 = vadd.f32 %v2354_v16, %v1337_v31  ;;  %v1309_v17 = vadd.f32 %v1722_v11, %v1696_v2  ;;  %v1316_v24 = vpop.f32.mrf.mxu1 }
 0x185   : > { %1392 = vst.msk [vmem:[%s2362_s24 + $0x4] sm:$0xf] %vm1390_vm9, %v1662_v45  ;;  %v1667_v10 = vpack.c.bf16 %v1356_v36, %v1356_v36  ;;  %v1342_v59 = vmul.f32 %v2349_v58, %v1325_v47  ;;  %v1399_v8 = vunpack.c.l.bf16 %v1358_v3  ;;  %v1400_v27 = vunpack.c.h.bf16 %v1358_v3 }
 0x186   : > { %v1663_v13 = vpack.c.bf16 %v1352_v43, %v1352_v43  ;;  %v1338_v39 = vmul.f32 %v2349_v58, %v1309_v17 }
 0x187   : > { %1397 = vst.msk [vmem:[%s2362_s24 + $0x18] sm:$0xf] %vm1390_vm9, %v1667_v10  ;;  %v1357_v50 = vadd.f32 %v2354_v16, %v1342_v59  ;;  %v1408_v48 = vsel %vm975_vm6, %v1400_v27, -inf }
 0x188   : > { %1393 = vst.msk [vmem:[%s2362_s24 + $0x8] sm:$0xf] %vm1390_vm9, %v1663_v13  ;;  %v1353_v20 = vadd.f32 %v2354_v16, %v1338_v39 }
 0x189   : > { %v1668_v42 = vpack.c.bf16 %v1357_v50, %v1357_v50  ;;  %v1361_v28 = vpack.c.bf16 %v1357_v50, %v1356_v36 }
 0x18a   : > { %v1664_v1 = vpack.c.bf16 %v1353_v20, %v1353_v20  ;;  %v1359_v53 = vpack.c.bf16 %v1353_v20, %v1352_v43 }
 0x18b   : > { %1398 = vst.msk [vmem:[%s2362_s24 + $0x1c] sm:$0xf] %vm1390_vm9, %v1668_v42  ;;  %v1697_v21 = vpop.f32.mrf.mxu0  ;;  %v1405_v26 = vunpack.c.l.bf16 %v1361_v28  ;;  %v1406_v38 = vunpack.c.h.bf16 %v1361_v28 }
 0x18c   : > { %1394 = vst.msk [vmem:[%s2362_s24 + $0xc] sm:$0xf] %vm1390_vm9, %v1664_v1  ;;  %v1401_v29 = vunpack.c.l.bf16 %v1359_v53  ;;  %v1402_v18 = vunpack.c.h.bf16 %v1359_v53 }
 0x18d   : > { %v1698_v55 = vpop.f32.mrf.mxu0  ;;  %v1415_v7 = vsel %vm975_vm6, %v1405_v26, -inf  ;;  %v1417_v5 = vsel %vm975_vm6, %v1406_v38, -inf }
 0x18e   : > { %v1699_v0 = vadd.f32 %v1698_v55, %v1697_v21  ;;  %v1409_v11 = vsel %vm975_vm6, %v1401_v29, -inf  ;;  %v1410_v51 = vsel %vm975_vm6, %v1402_v18, -inf }
 0x18f   : > { %v1700_v30 = vpop.f32.mrf.mxu0  ;;  %v1416_v34 = vmax.f32 %v1409_v11, %v1415_v7  ;;  %v1418_v49 = vmax.f32 %v1410_v51, %v1417_v5 }
 0x190   : > { %v1314_v14 = vadd.f32 %v1699_v0, %v1313_v60 }
 0x191   : > { %v1701_v61 = vpop.f32.mrf.mxu0  ;;  %v1420_v32 = vmax.f32 %v1416_v34, %v1418_v49 }
 0x192   : > { %v1339_v54 = vmul.f32 %v2349_v58, %v1314_v14  ;;  %v1702_v40 = vadd.f32 %v1701_v61, %v1700_v30 }
 0x194   : > { %v1354_v33 = vadd.f32 %v2354_v16, %v1339_v54  ;;  %v1317_v35 = vadd.f32 %v1702_v40, %v1316_v24 }
 0x196   : > { %v1665_v46 = vpack.c.bf16 %v1354_v33, %v1354_v33  ;;  %v1340_v4 = vmul.f32 %v2349_v58, %v1317_v35 }
 0x198   : > { %1395 = vst.msk [vmem:[%s2362_s24 + $0x10] sm:$0xf] %vm1390_vm9, %v1665_v46  ;;  %v1355_v6 = vadd.f32 %v2354_v16, %v1340_v4  ;;  %v1407_v16 = vsel %vm975_vm6, %v1399_v8, -inf }
 0x19a   : > { %v1360_v22 = vpack.c.bf16 %v1355_v6, %v1354_v33  ;;  %v1666_v12 = vpack.c.bf16 %v1355_v6, %v1355_v6 }
 0x19c   : > { %1396 = vst.msk [vmem:[%s2362_s24 + $0x14] sm:$0xf] %vm1390_vm9, %v1666_v12  ;;  %v1403_v23 = vunpack.c.l.bf16 %v1360_v22  ;;  %v1404_v58 = vunpack.c.h.bf16 %v1360_v22 }
 0x19e   : > { %v1411_v15 = vsel %vm975_vm6, %v1403_v23, -inf  ;;  %v1413_v56 = vsel %vm975_vm6, %v1404_v58, -inf }
 0x19f   : > { %v1412_v25 = vmax.f32 %v1407_v16, %v1411_v15  ;;  %v1414_v63 = vmax.f32 %v1408_v48, %v1413_v56 }
 0x1a1   : > { %v1419_v19 = vmax.f32 %v1412_v25, %v1414_v63 }
 0x1a3   : > { %v1421_v60 = vmax.f32 %v1419_v19, %v1420_v32 }
 0x1a5   : > { %v1422_v44 = vrot.slane %v1421_v60, 4 }
 0x1a7   : > { %v1423_v52 = vmax.f32 %v1421_v60, %v1422_v44 }
 0x1a9   : > { %v1424_v62 = vrot.slane %v1423_v52, 2 }
 0x1ab   : > { %v1425_v41 = vmax.f32 %v1423_v52, %v1424_v62 }
 0x1ad   : > { %v1426_v57 = vrot.slane %v1425_v41, 1 }
 0x1af   : > { %v1427_v9 = vmax.f32 %v1425_v41, %v1426_v57 }
 0x1b1   : > { %1429 = vst.msk [vmem:[%s233_s27] sm:$0x1] %vm1428_vm10, %v1427_v9 }
 0x1b2 PF: > { %s16_s18 = sadd.s32 1, %s1791_s18  }
 0x1b3   : > { %p13_p4 = scmp.ge.s32.totalorder %s16_s18, 4  }
 0x1b5   :  { %15 = sbr.rel (!%p13_p4) target bundleno = 1 (0x1), region = 80 }

</bundles_post_ra>
